<compile_context>
chip_gen: v7x
topology: tpu7x:2x2x1
jax: 0.10.0
libtpu: 0.0.40
codegen_flags: <defaults>
</compile_context>

<pallas_src>
import jax
import jax.numpy as jnp
from jax import lax
from jax.experimental import pallas as pl
from jax.experimental.pallas import tpu as pltpu

INPUT_SIZE = 300
HIDDEN = 16
FC1_OUT = 256
NUM_CLASSES = 2
G_PAD = 128   # gate lanes padded to one full vreg width (6H = 96 -> 128)


def gru_fc_kernel(x_ref, w_ih_ref, w_hh_ref, fc1_ref, fc2_ref, out_ref, gi_ref):
    """x_ref:    (T*B, 2D)   row t*B+b = [x[b,t] | x[b,T-1-t]]
       w_ih_ref: (2D, 128)   input->gate weights; fwd gate lanes use rows 0:D,
                             bwd gate lanes use rows D:2D; cols
                             [r_f r_b z_f z_b n_f n_b pad]
       w_hh_ref: (2H, 128)   block-diagonal hidden->gate weights (same cols)
       fc1_ref:  (2H, 256)   fc1.weight.T
       fc2_ref:  (2, 256)    fc2.weight (lane-dense)
       out_ref:  (B, 2)
       gi_ref:   (T*B, 128)  VMEM scratch with the hoisted, direction-merged
                             input projection."""
    B = out_ref.shape[0]
    TB = gi_ref.shape[0]
    T = TB // B
    H2 = w_hh_ref.shape[0]            # 2H = 32
    H = H2 // 2

    # 1) Hoisted input projection: all timesteps, both directions, all gates,
    #    already merged per timestep -> one MXU matmul, unmasked 128-lane store.
    gi_ref[...] = jnp.dot(x_ref[...], w_ih_ref[...],
                          preferred_element_type=jnp.float32)

    # 2) Bidirectional recurrence, both directions stacked along lanes.
    w_hh = w_hh_ref[...]                                   # tiny, stays resident

    def step(t, h):
        i = pl.multiple_of(t * B, 8)
        gi = gi_ref[pl.ds(i, B), :]                                    # (B, 128)
        gh = jnp.dot(h, w_hh, preferred_element_type=jnp.float32)      # (B, 128)
        # fused r/z sigmoid: one 64-lane EUP push instead of two 32-lane ones
        rz = jax.nn.sigmoid(gi[:, 0:2 * H2] + gh[:, 0:2 * H2])
        r = rz[:, 0:H2]
        z = rz[:, H2:2 * H2]
        n = jnp.tanh(gi[:, 2 * H2:3 * H2] + r * gh[:, 2 * H2:3 * H2])
        return (1.0 - z) * n + z * h

    h0 = jnp.zeros((B, H2), dtype=jnp.float32)
    h_cat = lax.fori_loop(0, T, step, h0, unroll=True)     # (B, 2H) = [h_f | h_b]

    # 3) Epilogue: h_cat already equals concat(h_n[0], h_n[1], dim=1).
    hid = jnp.maximum(
        jnp.dot(h_cat, fc1_ref[...], preferred_element_type=jnp.float32), 0.0)
    out_ref[...] = lax.dot_general(
        hid, fc2_ref[...], (((1,), (1,)), ((), ())),
        preferred_element_type=jnp.float32)


def _pack_weights(w_ih_f, w_hh_f, w_ih_b, w_hh_b, H, D):
    """PyTorch stores w_ih/w_hh as (3H, in) with gate order [r, z, n].
    Returns lane-dense packed weights (gate columns [r_f r_b z_f z_b n_f n_b],
    zero-padded to 128 lanes):
      w_ih_big: (2D, 128)  fwd gate lanes driven by input rows 0:D,
                           bwd gate lanes driven by input rows D:2D
      w_hh_bd:  (2H, 128)  block-diagonal so [h_f | h_b] @ w_hh_bd matches."""
    zeros_ih = jnp.zeros((D, H), jnp.float32)
    zeros_hh = jnp.zeros((H, H), jnp.float32)
    i_cols, h_cols = [], []
    for g in range(3):
        wf = w_ih_f[g * H:(g + 1) * H, :].T.astype(jnp.float32)   # (D, H)
        wb = w_ih_b[g * H:(g + 1) * H, :].T.astype(jnp.float32)   # (D, H)
        i_cols.append(jnp.concatenate([wf, zeros_ih], axis=0))    # fwd gate lanes
        i_cols.append(jnp.concatenate([zeros_ih, wb], axis=0))    # bwd gate lanes
        f_blk = w_hh_f[g * H:(g + 1) * H, :].T.astype(jnp.float32)
        b_blk = w_hh_b[g * H:(g + 1) * H, :].T.astype(jnp.float32)
        h_cols.append(jnp.concatenate([f_blk, zeros_hh], axis=0))
        h_cols.append(jnp.concatenate([zeros_hh, b_blk], axis=0))
    w_ih_big = jnp.concatenate(i_cols, axis=1)     # (2D, 6H)
    w_hh_bd = jnp.concatenate(h_cols, axis=1)      # (2H, 6H)
    pad = G_PAD - 6 * H
    w_ih_big = jnp.pad(w_ih_big, ((0, 0), (0, pad)))
    w_hh_bd = jnp.pad(w_hh_bd, ((0, 0), (0, pad)))
    return w_ih_big, w_hh_bd


def init_params(key, hidden_size=HIDDEN):
    """Deterministic PyTorch-style uniform init. Shapes match nn.GRU / nn.Linear."""
    ks = jax.random.split(key, 6)
    k_gru = 1.0 / jnp.sqrt(hidden_size)
    k_fc1 = 1.0 / jnp.sqrt(2 * hidden_size)
    k_fc2 = 1.0 / jnp.sqrt(FC1_OUT)
    u = lambda k, shape, bound: jax.random.uniform(
        k, shape, jnp.float32, minval=-bound, maxval=bound)
    w_ih_f = u(ks[0], (3 * hidden_size, INPUT_SIZE), k_gru)   # weight_ih_l0
    w_hh_f = u(ks[1], (3 * hidden_size, hidden_size), k_gru)  # weight_hh_l0
    w_ih_b = u(ks[2], (3 * hidden_size, INPUT_SIZE), k_gru)   # weight_ih_l0_reverse
    w_hh_b = u(ks[3], (3 * hidden_size, hidden_size), k_gru)  # weight_hh_l0_reverse
    w_fc1 = u(ks[4], (FC1_OUT, 2 * hidden_size), k_fc1)       # fc1.weight
    w_fc2 = u(ks[5], (NUM_CLASSES, FC1_OUT), k_fc2)           # fc2.weight
    return (w_ih_f, w_hh_f, w_ih_b, w_hh_b, w_fc1, w_fc2)


def gru_model_forward(x, params):
    """x: (B, T, 300) float32 (batch-first, like PyTorch). Returns (B, 2)."""
    w_ih_f, w_hh_f, w_ih_b, w_hh_b, w_fc1, w_fc2 = params
    B, T, D = x.shape
    H = w_hh_f.shape[1]

    # pad batch to a multiple of 8 (sublanes) so per-step row slices are aligned
    B_pad = ((B + 7) // 8) * 8
    if B_pad != B:
        x = jnp.pad(x, ((0, B_pad - B), (0, 0), (0, 0)))

    # time-major; row t*B+b = [x[b,t] | x[b,T-1-t]] so the direction merge is
    # baked into the (single) hoisted projection instead of the serial loop.
    x_tm = jnp.transpose(x, (1, 0, 2)).astype(jnp.float32)        # (T, B_pad, D)
    x_cat = jnp.concatenate([x_tm, x_tm[::-1]], axis=-1)          # (T, B_pad, 2D)
    x2d = x_cat.reshape(T * B_pad, 2 * D)

    w_ih_big, w_hh_bd = _pack_weights(w_ih_f, w_hh_f, w_ih_b, w_hh_b, H, D)
    fc1_t = w_fc1.T.astype(jnp.float32)        # (2H, 256)
    fc2 = w_fc2.astype(jnp.float32)            # (2, 256) lane-dense

    # TODO(synk): for B_pad >= a few hundred on v7x, add a leading batch-block
    # grid axis with dimension_semantics=("parallel",) to use both TensorCores.
    vmem = pl.BlockSpec(memory_space=pltpu.MemorySpace.VMEM)
    out = pl.pallas_call(
        gru_fc_kernel,
        out_shape=jax.ShapeDtypeStruct((B_pad, NUM_CLASSES), jnp.float32),
        in_specs=[vmem] * 5,
        out_specs=vmem,
        scratch_shapes=[pltpu.VMEM((T * B_pad, G_PAD), jnp.float32)],
        compiler_params=pltpu.CompilerParams(
            vmem_limit_bytes=32 * 1024 * 1024),
    )(x2d, w_ih_big, w_hh_bd, fc1_t, fc2)
    return out[:B]


def reference_forward(x, params):
    """Pure-JAX reference mirroring the PyTorch forward."""
    w_ih_f, w_hh_f, w_ih_b, w_hh_b, w_fc1, w_fc2 = params
    B, T, D = x.shape
    H = w_hh_f.shape[1]

    def cell(x_t, h, w_ih, w_hh):
        gi = x_t @ w_ih.T
        gh = h @ w_hh.T
        ir, iz, inn = gi[:, :H], gi[:, H:2 * H], gi[:, 2 * H:]
        hr, hz, hn = gh[:, :H], gh[:, H:2 * H], gh[:, 2 * H:]
        r = jax.nn.sigmoid(ir + hr)
        z = jax.nn.sigmoid(iz + hz)
        n = jnp.tanh(inn + r * hn)
        return (1.0 - z) * n + z * h

    h_f = jnp.zeros((B, H), jnp.float32)
    h_b = jnp.zeros((B, H), jnp.float32)
    for t in range(T):
        h_f = cell(x[:, t], h_f, w_ih_f, w_hh_f)
        h_b = cell(x[:, T - 1 - t], h_b, w_ih_b, w_hh_b)
    cat = jnp.concatenate([h_f, h_b], axis=1)
    hid = jnp.maximum(cat @ w_fc1.T, 0.0)
    return hid @ w_fc2.T


if __name__ == "__main__":
    key = jax.random.PRNGKey(0)
    k_x, k_p = jax.random.split(key)

    B, T = 2, 8
    x = jax.random.normal(k_x, (B, T, INPUT_SIZE), dtype=jnp.float32)
    params = init_params(k_p, HIDDEN)

    out = gru_model_forward(x, params)
    out = jax.block_until_ready(out)

    ref = jax.block_until_ready(reference_forward(x, params))
    assert out.shape == (B, NUM_CLASSES)
    assert jnp.allclose(out, ref, rtol=1e-3, atol=1e-4), (out, ref)

    print("KERNEL_OK")
</pallas_src>

<mosaic_0001>
module attributes {stable_mosaic.version = 11 : i64} {
  func.func @gru_fc_kernel(%arg0: memref<64x600xf32, #tpu.memory_space<vmem>>, %arg1: memref<600x128xf32, #tpu.memory_space<vmem>>, %arg2: memref<32x128xf32, #tpu.memory_space<vmem>>, %arg3: memref<32x256xf32, #tpu.memory_space<vmem>>, %arg4: memref<2x256xf32, #tpu.memory_space<vmem>>, %arg5: memref<8x2xf32, #tpu.memory_space<vmem>>, %arg6: memref<64x128xf32, #tpu.memory_space<vmem>>) attributes {dimension_semantics = [], scalar_prefetch = 0 : i64, scratch_operands = 1 : i64, tpu.core_type = #tpu.core_type<tc>} {
    %c0 = arith.constant 0 : index
    %c0_0 = arith.constant 0 : index
    %0 = vector.load %arg0[%c0, %c0_0] : memref<64x600xf32, #tpu.memory_space<vmem>>, vector<64x600xf32>
    %c0_1 = arith.constant 0 : index
    %c0_2 = arith.constant 0 : index
    %1 = vector.load %arg1[%c0_1, %c0_2] : memref<600x128xf32, #tpu.memory_space<vmem>>, vector<600x128xf32>
    %cst = arith.constant dense<0.000000e+00> : vector<64x128xf32>
    %2 = tpu.matmul %0, %1, %cst {dimension_numbers = #tpu.dot_dimension_numbers<[1], [0], [0], [1], [0, 0, 1, 1], [], []>} : vector<64x600xf32>, vector<600x128xf32>, vector<64x128xf32> -> vector<64x128xf32>
    %c0_3 = arith.constant 0 : index
    %c0_4 = arith.constant 0 : index
    %3 = vector.load %arg6[%c0_3, %c0_4] : memref<64x128xf32, #tpu.memory_space<vmem>>, vector<64x128xf32>
    tpu.vector_store %arg6[%c0_3, %c0_4], %2 {strides = array<i32>} : memref<64x128xf32, #tpu.memory_space<vmem>>, vector<64x128xf32>,
    %c0_5 = arith.constant 0 : index
    %c0_6 = arith.constant 0 : index
    %4 = vector.load %arg2[%c0_5, %c0_6] : memref<32x128xf32, #tpu.memory_space<vmem>>, vector<32x128xf32>
    %cst_7 = arith.constant 0.000000e+00 : f32
    %5 = vector.broadcast %cst_7 : f32 to vector<8x32xf32>
    %c0_i32 = arith.constant 0 : i32
    %c8_i32 = arith.constant 8 : i32
    %6 = arith.muli %c0_i32, %c8_i32 : i32
    %7 = tpu.assume_multiple %6, 8 : i32
    %8 = arith.index_cast %7 : i32 to index
    %c0_8 = arith.constant 0 : index
    %9 = vector.load %arg6[%8, %c0_8] : memref<64x128xf32, #tpu.memory_space<vmem>>, vector<8x128xf32>
    %cst_9 = arith.constant dense<0.000000e+00> : vector<8x128xf32>
    %10 = tpu.matmul %5, %4, %cst_9 {dimension_numbers = #tpu.dot_dimension_numbers<[1], [0], [0], [1], [0, 0, 1, 1], [], []>} : vector<8x32xf32>, vector<32x128xf32>, vector<8x128xf32> -> vector<8x128xf32>
    %11 = vector.extract_strided_slice %9 {offsets = [0, 0], sizes = [8, 64], strides = [1, 1]} : vector<8x128xf32> to vector<8x64xf32>
    %12 = vector.extract_strided_slice %10 {offsets = [0, 0], sizes = [8, 64], strides = [1, 1]} : vector<8x128xf32> to vector<8x64xf32>
    %13 = arith.addf %11, %12 : vector<8x64xf32>
    %14 = arith.negf %13 : vector<8x64xf32>
    %15 = math.exp %14 : vector<8x64xf32>
    %cst_10 = arith.constant 1.000000e+00 : f32
    %16 = vector.broadcast %cst_10 : f32 to vector<8x64xf32>
    %17 = arith.addf %16, %15 : vector<8x64xf32>
    %18 = arith.divf %16, %17 : vector<8x64xf32>
    %19 = vector.extract_strided_slice %18 {offsets = [0, 0], sizes = [8, 32], strides = [1, 1]} : vector<8x64xf32> to vector<8x32xf32>
    %20 = vector.extract_strided_slice %18 {offsets = [0, 32], sizes = [8, 32], strides = [1, 1]} : vector<8x64xf32> to vector<8x32xf32>
    %21 = vector.extract_strided_slice %9 {offsets = [0, 64], sizes = [8, 32], strides = [1, 1]} : vector<8x128xf32> to vector<8x32xf32>
    %22 = vector.extract_strided_slice %10 {offsets = [0, 64], sizes = [8, 32], strides = [1, 1]} : vector<8x128xf32> to vector<8x32xf32>
    %23 = arith.mulf %19, %22 : vector<8x32xf32>
    %24 = arith.addf %21, %23 : vector<8x32xf32>
    %25 = math.tanh %24 : vector<8x32xf32>
    %cst_11 = arith.constant 1.000000e+00 : f32
    %26 = vector.broadcast %cst_11 : f32 to vector<8x32xf32>
    %27 = arith.subf %26, %20 : vector<8x32xf32>
    %28 = arith.mulf %27, %25 : vector<8x32xf32>
    %29 = arith.mulf %20, %5 : vector<8x32xf32>
    %30 = arith.addf %28, %29 : vector<8x32xf32>
    %c1_i32 = arith.constant 1 : i32
    %c8_i32_12 = arith.constant 8 : i32
    %31 = arith.muli %c1_i32, %c8_i32_12 : i32
    %32 = tpu.assume_multiple %31, 8 : i32
    %33 = arith.index_cast %32 : i32 to index
    %c0_13 = arith.constant 0 : index
    %34 = vector.load %arg6[%33, %c0_13] : memref<64x128xf32, #tpu.memory_space<vmem>>, vector<8x128xf32>
    %cst_14 = arith.constant dense<0.000000e+00> : vector<8x128xf32>
    %35 = tpu.matmul %30, %4, %cst_14 {dimension_numbers = #tpu.dot_dimension_numbers<[1], [0], [0], [1], [0, 0, 1, 1], [], []>} : vector<8x32xf32>, vector<32x128xf32>, vector<8x128xf32> -> vector<8x128xf32>
    %36 = vector.extract_strided_slice %34 {offsets = [0, 0], sizes = [8, 64], strides = [1, 1]} : vector<8x128xf32> to vector<8x64xf32>
    %37 = vector.extract_strided_slice %35 {offsets = [0, 0], sizes = [8, 64], strides = [1, 1]} : vector<8x128xf32> to vector<8x64xf32>
    %38 = arith.addf %36, %37 : vector<8x64xf32>
    %39 = arith.negf %38 : vector<8x64xf32>
    %40 = math.exp %39 : vector<8x64xf32>
    %cst_15 = arith.constant 1.000000e+00 : f32
    %41 = vector.broadcast %cst_15 : f32 to vector<8x64xf32>
    %42 = arith.addf %41, %40 : vector<8x64xf32>
    %43 = arith.divf %41, %42 : vector<8x64xf32>
    %44 = vector.extract_strided_slice %43 {offsets = [0, 0], sizes = [8, 32], strides = [1, 1]} : vector<8x64xf32> to vector<8x32xf32>
    %45 = vector.extract_strided_slice %43 {offsets = [0, 32], sizes = [8, 32], strides = [1, 1]} : vector<8x64xf32> to vector<8x32xf32>
    %46 = vector.extract_strided_slice %34 {offsets = [0, 64], sizes = [8, 32], strides = [1, 1]} : vector<8x128xf32> to vector<8x32xf32>
    %47 = vector.extract_strided_slice %35 {offsets = [0, 64], sizes = [8, 32], strides = [1, 1]} : vector<8x128xf32> to vector<8x32xf32>
    %48 = arith.mulf %44, %47 : vector<8x32xf32>
    %49 = arith.addf %46, %48 : vector<8x32xf32>
    %50 = math.tanh %49 : vector<8x32xf32>
    %cst_16 = arith.constant 1.000000e+00 : f32
    %51 = vector.broadcast %cst_16 : f32 to vector<8x32xf32>
    %52 = arith.subf %51, %45 : vector<8x32xf32>
    %53 = arith.mulf %52, %50 : vector<8x32xf32>
    %54 = arith.mulf %45, %30 : vector<8x32xf32>
    %55 = arith.addf %53, %54 : vector<8x32xf32>
    %c2_i32 = arith.constant 2 : i32
    %c8_i32_17 = arith.constant 8 : i32
    %56 = arith.muli %c2_i32, %c8_i32_17 : i32
    %57 = tpu.assume_multiple %56, 8 : i32
    %58 = arith.index_cast %57 : i32 to index
    %c0_18 = arith.constant 0 : index
    %59 = vector.load %arg6[%58, %c0_18] : memref<64x128xf32, #tpu.memory_space<vmem>>, vector<8x128xf32>
    %cst_19 = arith.constant dense<0.000000e+00> : vector<8x128xf32>
    %60 = tpu.matmul %55, %4, %cst_19 {dimension_numbers = #tpu.dot_dimension_numbers<[1], [0], [0], [1], [0, 0, 1, 1], [], []>} : vector<8x32xf32>, vector<32x128xf32>, vector<8x128xf32> -> vector<8x128xf32>
    %61 = vector.extract_strided_slice %59 {offsets = [0, 0], sizes = [8, 64], strides = [1, 1]} : vector<8x128xf32> to vector<8x64xf32>
    %62 = vector.extract_strided_slice %60 {offsets = [0, 0], sizes = [8, 64], strides = [1, 1]} : vector<8x128xf32> to vector<8x64xf32>
    %63 = arith.addf %61, %62 : vector<8x64xf32>
    %64 = arith.negf %63 : vector<8x64xf32>
    %65 = math.exp %64 : vector<8x64xf32>
    %cst_20 = arith.constant 1.000000e+00 : f32
    %66 = vector.broadcast %cst_20 : f32 to vector<8x64xf32>
    %67 = arith.addf %66, %65 : vector<8x64xf32>
    %68 = arith.divf %66, %67 : vector<8x64xf32>
    %69 = vector.extract_strided_slice %68 {offsets = [0, 0], sizes = [8, 32], strides = [1, 1]} : vector<8x64xf32> to vector<8x32xf32>
    %70 = vector.extract_strided_slice %68 {offsets = [0, 32], sizes = [8, 32], strides = [1, 1]} : vector<8x64xf32> to vector<8x32xf32>
    %71 = vector.extract_strided_slice %59 {offsets = [0, 64], sizes = [8, 32], strides = [1, 1]} : vector<8x128xf32> to vector<8x32xf32>
    %72 = vector.extract_strided_slice %60 {offsets = [0, 64], sizes = [8, 32], strides = [1, 1]} : vector<8x128xf32> to vector<8x32xf32>
    %73 = arith.mulf %69, %72 : vector<8x32xf32>
    %74 = arith.addf %71, %73 : vector<8x32xf32>
    %75 = math.tanh %74 : vector<8x32xf32>
    %cst_21 = arith.constant 1.000000e+00 : f32
    %76 = vector.broadcast %cst_21 : f32 to vector<8x32xf32>
    %77 = arith.subf %76, %70 : vector<8x32xf32>
    %78 = arith.mulf %77, %75 : vector<8x32xf32>
    %79 = arith.mulf %70, %55 : vector<8x32xf32>
    %80 = arith.addf %78, %79 : vector<8x32xf32>
    %c3_i32 = arith.constant 3 : i32
    %c8_i32_22 = arith.constant 8 : i32
    %81 = arith.muli %c3_i32, %c8_i32_22 : i32
    %82 = tpu.assume_multiple %81, 8 : i32
    %83 = arith.index_cast %82 : i32 to index
    %c0_23 = arith.constant 0 : index
    %84 = vector.load %arg6[%83, %c0_23] : memref<64x128xf32, #tpu.memory_space<vmem>>, vector<8x128xf32>
    %cst_24 = arith.constant dense<0.000000e+00> : vector<8x128xf32>
    %85 = tpu.matmul %80, %4, %cst_24 {dimension_numbers = #tpu.dot_dimension_numbers<[1], [0], [0], [1], [0, 0, 1, 1], [], []>} : vector<8x32xf32>, vector<32x128xf32>, vector<8x128xf32> -> vector<8x128xf32>
    %86 = vector.extract_strided_slice %84 {offsets = [0, 0], sizes = [8, 64], strides = [1, 1]} : vector<8x128xf32> to vector<8x64xf32>
    %87 = vector.extract_strided_slice %85 {offsets = [0, 0], sizes = [8, 64], strides = [1, 1]} : vector<8x128xf32> to vector<8x64xf32>
    %88 = arith.addf %86, %87 : vector<8x64xf32>
    %89 = arith.negf %88 : vector<8x64xf32>
    %90 = math.exp %89 : vector<8x64xf32>
    %cst_25 = arith.constant 1.000000e+00 : f32
    %91 = vector.broadcast %cst_25 : f32 to vector<8x64xf32>
    %92 = arith.addf %91, %90 : vector<8x64xf32>
    %93 = arith.divf %91, %92 : vector<8x64xf32>
    %94 = vector.extract_strided_slice %93 {offsets = [0, 0], sizes = [8, 32], strides = [1, 1]} : vector<8x64xf32> to vector<8x32xf32>
    %95 = vector.extract_strided_slice %93 {offsets = [0, 32], sizes = [8, 32], strides = [1, 1]} : vector<8x64xf32> to vector<8x32xf32>
    %96 = vector.extract_strided_slice %84 {offsets = [0, 64], sizes = [8, 32], strides = [1, 1]} : vector<8x128xf32> to vector<8x32xf32>
    %97 = vector.extract_strided_slice %85 {offsets = [0, 64], sizes = [8, 32], strides = [1, 1]} : vector<8x128xf32> to vector<8x32xf32>
    %98 = arith.mulf %94, %97 : vector<8x32xf32>
    %99 = arith.addf %96, %98 : vector<8x32xf32>
    %100 = math.tanh %99 : vector<8x32xf32>
    %cst_26 = arith.constant 1.000000e+00 : f32
    %101 = vector.broadcast %cst_26 : f32 to vector<8x32xf32>
    %102 = arith.subf %101, %95 : vector<8x32xf32>
    %103 = arith.mulf %102, %100 : vector<8x32xf32>
    %104 = arith.mulf %95, %80 : vector<8x32xf32>
    %105 = arith.addf %103, %104 : vector<8x32xf32>
    %c4_i32 = arith.constant 4 : i32
    %c8_i32_27 = arith.constant 8 : i32
    %106 = arith.muli %c4_i32, %c8_i32_27 : i32
    %107 = tpu.assume_multiple %106, 8 : i32
    %108 = arith.index_cast %107 : i32 to index
    %c0_28 = arith.constant 0 : index
    %109 = vector.load %arg6[%108, %c0_28] : memref<64x128xf32, #tpu.memory_space<vmem>>, vector<8x128xf32>
    %cst_29 = arith.constant dense<0.000000e+00> : vector<8x128xf32>
    %110 = tpu.matmul %105, %4, %cst_29 {dimension_numbers = #tpu.dot_dimension_numbers<[1], [0], [0], [1], [0, 0, 1, 1], [], []>} : vector<8x32xf32>, vector<32x128xf32>, vector<8x128xf32> -> vector<8x128xf32>
    %111 = vector.extract_strided_slice %109 {offsets = [0, 0], sizes = [8, 64], strides = [1, 1]} : vector<8x128xf32> to vector<8x64xf32>
    %112 = vector.extract_strided_slice %110 {offsets = [0, 0], sizes = [8, 64], strides = [1, 1]} : vector<8x128xf32> to vector<8x64xf32>
    %113 = arith.addf %111, %112 : vector<8x64xf32>
    %114 = arith.negf %113 : vector<8x64xf32>
    %115 = math.exp %114 : vector<8x64xf32>
    %cst_30 = arith.constant 1.000000e+00 : f32
    %116 = vector.broadcast %cst_30 : f32 to vector<8x64xf32>
    %117 = arith.addf %116, %115 : vector<8x64xf32>
    %118 = arith.divf %116, %117 : vector<8x64xf32>
    %119 = vector.extract_strided_slice %118 {offsets = [0, 0], sizes = [8, 32], strides = [1, 1]} : vector<8x64xf32> to vector<8x32xf32>
    %120 = vector.extract_strided_slice %118 {offsets = [0, 32], sizes = [8, 32], strides = [1, 1]} : vector<8x64xf32> to vector<8x32xf32>
    %121 = vector.extract_strided_slice %109 {offsets = [0, 64], sizes = [8, 32], strides = [1, 1]} : vector<8x128xf32> to vector<8x32xf32>
    %122 = vector.extract_strided_slice %110 {offsets = [0, 64], sizes = [8, 32], strides = [1, 1]} : vector<8x128xf32> to vector<8x32xf32>
    %123 = arith.mulf %119, %122 : vector<8x32xf32>
    %124 = arith.addf %121, %123 : vector<8x32xf32>
    %125 = math.tanh %124 : vector<8x32xf32>
    %cst_31 = arith.constant 1.000000e+00 : f32
    %126 = vector.broadcast %cst_31 : f32 to vector<8x32xf32>
    %127 = arith.subf %126, %120 : vector<8x32xf32>
    %128 = arith.mulf %127, %125 : vector<8x32xf32>
    %129 = arith.mulf %120, %105 : vector<8x32xf32>
    %130 = arith.addf %128, %129 : vector<8x32xf32>
    %c5_i32 = arith.constant 5 : i32
    %c8_i32_32 = arith.constant 8 : i32
    %131 = arith.muli %c5_i32, %c8_i32_32 : i32
    %132 = tpu.assume_multiple %131, 8 : i32
    %133 = arith.index_cast %132 : i32 to index
    %c0_33 = arith.constant 0 : index
    %134 = vector.load %arg6[%133, %c0_33] : memref<64x128xf32, #tpu.memory_space<vmem>>, vector<8x128xf32>
    %cst_34 = arith.constant dense<0.000000e+00> : vector<8x128xf32>
    %135 = tpu.matmul %130, %4, %cst_34 {dimension_numbers = #tpu.dot_dimension_numbers<[1], [0], [0], [1], [0, 0, 1, 1], [], []>} : vector<8x32xf32>, vector<32x128xf32>, vector<8x128xf32> -> vector<8x128xf32>
    %136 = vector.extract_strided_slice %134 {offsets = [0, 0], sizes = [8, 64], strides = [1, 1]} : vector<8x128xf32> to vector<8x64xf32>
    %137 = vector.extract_strided_slice %135 {offsets = [0, 0], sizes = [8, 64], strides = [1, 1]} : vector<8x128xf32> to vector<8x64xf32>
    %138 = arith.addf %136, %137 : vector<8x64xf32>
    %139 = arith.negf %138 : vector<8x64xf32>
    %140 = math.exp %139 : vector<8x64xf32>
    %cst_35 = arith.constant 1.000000e+00 : f32
    %141 = vector.broadcast %cst_35 : f32 to vector<8x64xf32>
    %142 = arith.addf %141, %140 : vector<8x64xf32>
    %143 = arith.divf %141, %142 : vector<8x64xf32>
    %144 = vector.extract_strided_slice %143 {offsets = [0, 0], sizes = [8, 32], strides = [1, 1]} : vector<8x64xf32> to vector<8x32xf32>
    %145 = vector.extract_strided_slice %143 {offsets = [0, 32], sizes = [8, 32], strides = [1, 1]} : vector<8x64xf32> to vector<8x32xf32>
    %146 = vector.extract_strided_slice %134 {offsets = [0, 64], sizes = [8, 32], strides = [1, 1]} : vector<8x128xf32> to vector<8x32xf32>
    %147 = vector.extract_strided_slice %135 {offsets = [0, 64], sizes = [8, 32], strides = [1, 1]} : vector<8x128xf32> to vector<8x32xf32>
    %148 = arith.mulf %144, %147 : vector<8x32xf32>
    %149 = arith.addf %146, %148 : vector<8x32xf32>
    %150 = math.tanh %149 : vector<8x32xf32>
    %cst_36 = arith.constant 1.000000e+00 : f32
    %151 = vector.broadcast %cst_36 : f32 to vector<8x32xf32>
    %152 = arith.subf %151, %145 : vector<8x32xf32>
    %153 = arith.mulf %152, %150 : vector<8x32xf32>
    %154 = arith.mulf %145, %130 : vector<8x32xf32>
    %155 = arith.addf %153, %154 : vector<8x32xf32>
    %c6_i32 = arith.constant 6 : i32
    %c8_i32_37 = arith.constant 8 : i32
    %156 = arith.muli %c6_i32, %c8_i32_37 : i32
    %157 = tpu.assume_multiple %156, 8 : i32
    %158 = arith.index_cast %157 : i32 to index
    %c0_38 = arith.constant 0 : index
    %159 = vector.load %arg6[%158, %c0_38] : memref<64x128xf32, #tpu.memory_space<vmem>>, vector<8x128xf32>
    %cst_39 = arith.constant dense<0.000000e+00> : vector<8x128xf32>
    %160 = tpu.matmul %155, %4, %cst_39 {dimension_numbers = #tpu.dot_dimension_numbers<[1], [0], [0], [1], [0, 0, 1, 1], [], []>} : vector<8x32xf32>, vector<32x128xf32>, vector<8x128xf32> -> vector<8x128xf32>
    %161 = vector.extract_strided_slice %159 {offsets = [0, 0], sizes = [8, 64], strides = [1, 1]} : vector<8x128xf32> to vector<8x64xf32>
    %162 = vector.extract_strided_slice %160 {offsets = [0, 0], sizes = [8, 64], strides = [1, 1]} : vector<8x128xf32> to vector<8x64xf32>
    %163 = arith.addf %161, %162 : vector<8x64xf32>
    %164 = arith.negf %163 : vector<8x64xf32>
    %165 = math.exp %164 : vector<8x64xf32>
    %cst_40 = arith.constant 1.000000e+00 : f32
    %166 = vector.broadcast %cst_40 : f32 to vector<8x64xf32>
    %167 = arith.addf %166, %165 : vector<8x64xf32>
    %168 = arith.divf %166, %167 : vector<8x64xf32>
    %169 = vector.extract_strided_slice %168 {offsets = [0, 0], sizes = [8, 32], strides = [1, 1]} : vector<8x64xf32> to vector<8x32xf32>
    %170 = vector.extract_strided_slice %168 {offsets = [0, 32], sizes = [8, 32], strides = [1, 1]} : vector<8x64xf32> to vector<8x32xf32>
    %171 = vector.extract_strided_slice %159 {offsets = [0, 64], sizes = [8, 32], strides = [1, 1]} : vector<8x128xf32> to vector<8x32xf32>
    %172 = vector.extract_strided_slice %160 {offsets = [0, 64], sizes = [8, 32], strides = [1, 1]} : vector<8x128xf32> to vector<8x32xf32>
    %173 = arith.mulf %169, %172 : vector<8x32xf32>
    %174 = arith.addf %171, %173 : vector<8x32xf32>
    %175 = math.tanh %174 : vector<8x32xf32>
    %cst_41 = arith.constant 1.000000e+00 : f32
    %176 = vector.broadcast %cst_41 : f32 to vector<8x32xf32>
    %177 = arith.subf %176, %170 : vector<8x32xf32>
    %178 = arith.mulf %177, %175 : vector<8x32xf32>
    %179 = arith.mulf %170, %155 : vector<8x32xf32>
    %180 = arith.addf %178, %179 : vector<8x32xf32>
    %c7_i32 = arith.constant 7 : i32
    %c8_i32_42 = arith.constant 8 : i32
    %181 = arith.muli %c7_i32, %c8_i32_42 : i32
    %182 = tpu.assume_multiple %181, 8 : i32
    %183 = arith.index_cast %182 : i32 to index
    %c0_43 = arith.constant 0 : index
    %184 = vector.load %arg6[%183, %c0_43] : memref<64x128xf32, #tpu.memory_space<vmem>>, vector<8x128xf32>
    %cst_44 = arith.constant dense<0.000000e+00> : vector<8x128xf32>
    %185 = tpu.matmul %180, %4, %cst_44 {dimension_numbers = #tpu.dot_dimension_numbers<[1], [0], [0], [1], [0, 0, 1, 1], [], []>} : vector<8x32xf32>, vector<32x128xf32>, vector<8x128xf32> -> vector<8x128xf32>
    %186 = vector.extract_strided_slice %184 {offsets = [0, 0], sizes = [8, 64], strides = [1, 1]} : vector<8x128xf32> to vector<8x64xf32>
    %187 = vector.extract_strided_slice %185 {offsets = [0, 0], sizes = [8, 64], strides = [1, 1]} : vector<8x128xf32> to vector<8x64xf32>
    %188 = arith.addf %186, %187 : vector<8x64xf32>
    %189 = arith.negf %188 : vector<8x64xf32>
    %190 = math.exp %189 : vector<8x64xf32>
    %cst_45 = arith.constant 1.000000e+00 : f32
    %191 = vector.broadcast %cst_45 : f32 to vector<8x64xf32>
    %192 = arith.addf %191, %190 : vector<8x64xf32>
    %193 = arith.divf %191, %192 : vector<8x64xf32>
    %194 = vector.extract_strided_slice %193 {offsets = [0, 0], sizes = [8, 32], strides = [1, 1]} : vector<8x64xf32> to vector<8x32xf32>
    %195 = vector.extract_strided_slice %193 {offsets = [0, 32], sizes = [8, 32], strides = [1, 1]} : vector<8x64xf32> to vector<8x32xf32>
    %196 = vector.extract_strided_slice %184 {offsets = [0, 64], sizes = [8, 32], strides = [1, 1]} : vector<8x128xf32> to vector<8x32xf32>
    %197 = vector.extract_strided_slice %185 {offsets = [0, 64], sizes = [8, 32], strides = [1, 1]} : vector<8x128xf32> to vector<8x32xf32>
    %198 = arith.mulf %194, %197 : vector<8x32xf32>
    %199 = arith.addf %196, %198 : vector<8x32xf32>
    %200 = math.tanh %199 : vector<8x32xf32>
    %cst_46 = arith.constant 1.000000e+00 : f32
    %201 = vector.broadcast %cst_46 : f32 to vector<8x32xf32>
    %202 = arith.subf %201, %195 : vector<8x32xf32>
    %203 = arith.mulf %202, %200 : vector<8x32xf32>
    %204 = arith.mulf %195, %180 : vector<8x32xf32>
    %205 = arith.addf %203, %204 : vector<8x32xf32>
    %c8_i32_47 = arith.constant 8 : i32
    %c0_48 = arith.constant 0 : index
    %c0_49 = arith.constant 0 : index
    %206 = vector.load %arg3[%c0_48, %c0_49] : memref<32x256xf32, #tpu.memory_space<vmem>>, vector<32x256xf32>
    %cst_50 = arith.constant dense<0.000000e+00> : vector<8x256xf32>
    %207 = tpu.matmul %205, %206, %cst_50 {dimension_numbers = #tpu.dot_dimension_numbers<[1], [0], [0], [1], [0, 0, 1, 1], [], []>} : vector<8x32xf32>, vector<32x256xf32>, vector<8x256xf32> -> vector<8x256xf32>
    %cst_51 = arith.constant 0.000000e+00 : f32
    %208 = vector.broadcast %cst_51 : f32 to vector<8x256xf32>
    %209 = arith.maximumf %207, %208 : vector<8x256xf32>
    %c0_52 = arith.constant 0 : index
    %c0_53 = arith.constant 0 : index
    %210 = vector.load %arg4[%c0_52, %c0_53] : memref<2x256xf32, #tpu.memory_space<vmem>>, vector<2x256xf32>
    %cst_54 = arith.constant dense<0.000000e+00> : vector<8x2xf32>
    %211 = tpu.matmul %209, %210, %cst_54 {dimension_numbers = #tpu.dot_dimension_numbers<[1], [1], [0], [0], [0, 0, 1, 0], [], []>} : vector<8x256xf32>, vector<2x256xf32>, vector<8x2xf32> -> vector<8x2xf32>
    %c0_55 = arith.constant 0 : index
    %c0_56 = arith.constant 0 : index
    %212 = vector.load %arg5[%c0_55, %c0_56] : memref<8x2xf32, #tpu.memory_space<vmem>>, vector<8x2xf32>
    tpu.vector_store %arg5[%c0_55, %c0_56], %211 {strides = array<i32>} : memref<8x2xf32, #tpu.memory_space<vmem>>, vector<8x2xf32>,
    return
  }
}

</mosaic_0001>

<bundles_post_ra>
// kernel: tpu_custom_call.1
= control target key start
LH: loop header
LB: loop body
LE: loop exit
PB: predicated region body
PF: predicated region fallthrough
CT: control target
= control target key end

     0   :  { %10 = vsyncpa [#allocation4], 0  ;;  %s2398_s0 = inlined_call_operand.hbm [shape: f32[64,600], index: 0, kind: input, shape index: {}]   ;;  %s2399_s1 = inlined_call_operand.hbm [shape: f32[600,128], index: 1, kind: input, shape index: {}]   ;;  %s2400_s2 = inlined_call_operand.hbm [shape: f32[32,128], index: 2, kind: input, shape index: {}]   ;;  %s2401_s3 = inlined_call_operand.hbm [shape: f32[32,256], index: 3, kind: input, shape index: {}]   ;;  %s2402_s4 = inlined_call_operand.vmem [shape: f32[2,256], index: 4, kind: input, shape index: {}]   ;;  %s2403_s5 = inlined_call_operand.vmem [shape: f32[8,2], index: 5, kind: output, shape index: {}]  }
   0x1   :  { %11 = vsyncpa [#allocation6], 0 }
   0x2   :  { %12 = vsyncpa [#allocation9], 0  ;;  %s2156_s18 = smov [#allocation5]   ;;  %s2062_s22 = scalar_lea.hbm %s2399_s1, 9600 }
   0x3   :  { %s30_s19 = sshll.u32 %s2156_s18, 4  ;;  %p2063_p0 = scmp.ne.s32.totalorder %s2399_s1, %s2062_s22  ;;  %s31_s19 = int_to_ptr.vmem [resolvable:$true] %s30_s19 }
   0x4   :  { %p2066_p1 = scmp.lt.u32.totalorder %s2062_s22, %s2399_s1 }
   0x6   :  { %p2068_p2 = pnand %p2066_p1, %p2063_p0 }
   0x8   :  { %2071 = shalt.err (!%p2068_p2)
}
   0x9   :  { %s2072_s27 = scalar_lea.vmem %s31_s19, 9600  ;;  %p2077_p4 = scmp.lt.s32.totalorder %s31_s19, %s31_s19 }
   0xa   :  { %p2073_p3 = scmp.ne.s32.totalorder %s31_s19, %s2072_s27  ;;  %p2078_p5 = scmp.lt.s32.totalorder %s2072_s27, %s2072_s27 }
   0xc   :  { %p2079_p6 = por %p2078_p5, %p2077_p4 }
   0xe   :  { %p2080_p7 = pnand %p2079_p6, %p2073_p3 }
  0x10   :  { %2083 = shalt.err (!%p2080_p7)
}
  0x11   :  { %s2157_s28 = smov 128   ;;  %s2158_s29 = smov 8  }
  0x12   :  { %36 = dma.hbm_to_vmem [thread:$0]  %s2399_s1, 9600, %s31_s19, [#allocation6], %s2157_s28, %s2157_s28, %s2158_s29  }
  0x13   :  { %s2159_s7 = smov [#allocation3]   ;;  %s2084_s11 = scalar_lea.hbm %s2398_s0, 5120 }
  0x14   :  { %s18_s8 = sshll.u32 %s2159_s7, 4  ;;  %p2085_p8 = scmp.ne.s32.totalorder %s2398_s0, %s2084_s11  ;;  %s19_s8 = int_to_ptr.vmem [resolvable:$true] %s18_s8 }
  0x15   :  { %p2088_p9 = scmp.lt.u32.totalorder %s2084_s11, %s2398_s0 }
  0x17   :  { %p2090_p10 = pnand %p2088_p9, %p2085_p8 }
  0x19   :  { %2093 = shalt.err (!%p2090_p10)
}
  0x1a   :  { %s2094_s16 = scalar_lea.vmem %s19_s8, 5120  ;;  %p2099_p12 = scmp.lt.s32.totalorder %s19_s8, %s19_s8 }
  0x1b   :  { %p2095_p11 = scmp.ne.s32.totalorder %s19_s8, %s2094_s16  ;;  %p2100_p13 = scmp.lt.s32.totalorder %s2094_s16, %s2094_s16 }
  0x1d   :  { %p2101_p0 = por %p2100_p13, %p2099_p12 }
  0x1f   :  { %p2102_p1 = pnand %p2101_p0, %p2095_p11 }
  0x21   :  { %2105 = shalt.err (!%p2102_p1)
}
  0x22   :  { %s2160_s1 = smov 640   ;;  %s2161_s17 = smov 40  }
  0x23   :  { %24 = dma.hbm_to_vmem [thread:$0]  %s2398_s0, 5120, %s19_s8, [#allocation4], %s2160_s1, %s2160_s1, %s2161_s17  }
  0x24   :  { %s2162_s20 = smov [#allocation7]   ;;  %s2163_s22 = smov [#allocation8]  }
  0x25   :  { %s42_s21 = sshll.u32 %s2162_s20, 4  ;;  %s54_s23 = sshll.u32 %s2163_s22, 4  ;;  %s43_s21 = int_to_ptr.vmem [resolvable:$true] %s42_s21  ;;  %s2228_s23 = int_to_ptr.vmem [resolvable:$true] %s54_s23 }
  0x26   :  { %s2106_s26 = scalar_lea.hbm %s2400_s2, 512 }
  0x27   :  { %p2107_p2 = scmp.ne.s32.totalorder %s2400_s2, %s2106_s26  ;;  %p2110_p3 = scmp.lt.u32.totalorder %s2106_s26, %s2400_s2 }
  0x29   :  { %p2112_p4 = pnand %p2110_p3, %p2107_p2 }
  0x2b   :  { %2115 = shalt.err (!%p2112_p4)
}
  0x2c   :  { %s2116_s0 = scalar_lea.vmem %s43_s21, 512  ;;  %p2121_p6 = scmp.lt.s32.totalorder %s43_s21, %s43_s21 }
  0x2d   :  { %p2117_p5 = scmp.ne.s32.totalorder %s43_s21, %s2116_s0  ;;  %p2122_p7 = scmp.lt.s32.totalorder %s2116_s0, %s2116_s0 }
  0x2f   :  { %p2123_p8 = por %p2122_p7, %p2121_p6 }
  0x31   :  { %p2124_p9 = pnand %p2123_p8, %p2117_p5 }
  0x33   :  { %2127 = shalt.err (!%p2124_p9)
}
  0x34   :  { %48 = dma.hbm_to_vmem [thread:$0]  %s2400_s2, 512, %s43_s21, [#allocation6], %s2157_s28, %s2157_s28, %s2158_s29  }
  0x35   :  { %s2128_s12 = scalar_lea.hbm %s2401_s3, 1024 }
  0x36   :  { %p2129_p10 = scmp.ne.s32.totalorder %s2401_s3, %s2128_s12  ;;  %p2132_p11 = scmp.lt.u32.totalorder %s2128_s12, %s2401_s3 }
  0x38   :  { %p2134_p12 = pnand %p2132_p11, %p2129_p10 }
  0x3a   :  { %2137 = shalt.err (!%p2134_p12)
}
  0x3b   :  { %s2138_s1 = scalar_lea.vmem %s2228_s23, 1024  ;;  %p2143_p0 = scmp.lt.s32.totalorder %s2228_s23, %s2228_s23 }
  0x3c   :  { %p2139_p13 = scmp.ne.s32.totalorder %s2228_s23, %s2138_s1  ;;  %p2144_p1 = scmp.lt.s32.totalorder %s2138_s1, %s2138_s1 }
  0x3e   :  { %p2145_p2 = por %p2144_p1, %p2143_p0 }
  0x40   :  { %p2146_p3 = pnand %p2145_p2, %p2139_p13 }
  0x42   :  { %2149 = shalt.err (!%p2146_p3)
}
  0x43   :  { %s2164_s2 = smov 256   ;;  %s2165_s28 = smov 16  }
  0x44   :  { %60 = dma.hbm_to_vmem [thread:$0]  %s2401_s3, 1024, %s2228_s23, [#allocation9], %s2164_s2, %s2164_s2, %s2165_s28  }
  0x45   :  { %2150 = dma.done.wait [#allocation4], 5120  }
  0x46   :  { %2151 = vsyncadd [#allocation4], 4294962176 }
  0x47   :  { %2152 = dma.done.wait [#allocation6], 10112  }
  0x48   :  { %2153 = vsyncadd [#allocation6], 4294957184 }
  0x49   :  { %2154 = dma.done.wait [#allocation9], 1024  }
  0x4a   :  { %2155 = vsyncadd [#allocation9], 4294966272  ;;  %v131_v0 = vld [vmem:[#allocation5 + $0x80] sm:$0xff]  ;;  %v132_v1 = vld [vmem:[#allocation5 + $0x88] sm:$0xff]  ;;  %vm190_vm0 = vcmask 719872   ;;  %vm2167_vm1 = vmmov 0  }
  0x4b   :  { %v163_v2 = vld [vmem:[#allocation5 + $0x180] sm:$0xff]  ;;  %v1859_v3 = vpack.c.bf16 %v132_v1, %v131_v0  ;;  %v164_v4 = vld [vmem:[#allocation5 + $0x188] sm:$0xff]  ;;  %v133_v11 = vld [vmem:[#allocation5 + $0x90] sm:$0xff]  ;;  %s2169_s3 = smov 64   ;;  %s2170_s18 = smov 96   ;;  %vm543_vm2 = vcmask 261120  }
  0x4c   :  { %v115_v5 = vld [vmem:[#allocation5] sm:$0xff]  ;;  %v116_v6 = vld [vmem:[#allocation5 + $0x8] sm:$0xff]  ;;  %v1891_v7 = vpack.c.bf16 %v164_v4, %v163_v2  ;;  %v134_v13 = vld [vmem:[#allocation5 + $0x98] sm:$0xff]  ;;  %vm1532_vm3 = vcmask 15360  }
  0x4d   :  { %v1861_v8 = vpack.c.bf16 %v116_v6, %v115_v5  ;;  %v147_v9 = vld [vmem:[#allocation5 + $0x100] sm:$0xff]  ;;  %v148_v10 = vld [vmem:[#allocation5 + $0x108] sm:$0xff]  ;;  %1860 = vmatprep.subr.bf16.mxu0 %v1859_v3  ;;  %v165_v14 = vld [vmem:[#allocation5 + $0x190] sm:$0xff]  ;;  %v1863_v16 = vpack.c.bf16 %v134_v13, %v133_v11 }
  0x4e   :  { %v1893_v12 = vpack.c.bf16 %v148_v10, %v147_v9  ;;  %v166_v15 = vld [vmem:[#allocation5 + $0x198] sm:$0xff]  ;;  %1892 = vmatprep.subr.bf16.mxu1 %v1891_v7  ;;  %v117_v18 = vld [vmem:[#allocation5 + $0x10] sm:$0xff]  ;;  %v135_v23 = vld [vmem:[#allocation5 + $0xa0] sm:$0xff] }
  0x4f   :  { %1862 = vmatpush3.bf16.msra.mxu0 %v1861_v8  ;;  %v1895_v17 = vpack.c.bf16 %v166_v15, %v165_v14  ;;  %v118_v19 = vld [vmem:[#allocation5 + $0x18] sm:$0xff]  ;;  %v149_v20 = vld [vmem:[#allocation5 + $0x110] sm:$0xff]  ;;  %v136_v24 = vld [vmem:[#allocation5 + $0xa8] sm:$0xff] }
  0x50   :  { %1894 = vmatpush3.bf16.msra.mxu1 %v1893_v12  ;;  %v1865_v21 = vpack.c.bf16 %v118_v19, %v117_v18  ;;  %v150_v22 = vld [vmem:[#allocation5 + $0x118] sm:$0xff]  ;;  %1864 = vmatprep.subr.bf16.mxu0 %v1863_v16  ;;  %v1867_v26 = vpack.c.bf16 %v136_v24, %v135_v23  ;;  %v167_v27 = vld [vmem:[#allocation5 + $0x1a0] sm:$0xff]  ;;  %v168_v28 = vld [vmem:[#allocation5 + $0x1a8] sm:$0xff] }
  0x51   :  { %1896 = vmatprep.subr.bf16.mxu1 %v1895_v17  ;;  %v1897_v25 = vpack.c.bf16 %v150_v22, %v149_v20  ;;  %v119_v29 = vld [vmem:[#allocation5 + $0x20] sm:$0xff]  ;;  %v1899_v30 = vpack.c.bf16 %v168_v28, %v167_v27  ;;  %v120_v31 = vld [vmem:[#allocation5 + $0x28] sm:$0xff]  ;;  %v137_v35 = vld [vmem:[#allocation5 + $0xb0] sm:$0xff] }
  0x52   :  { %v151_v32 = vld [vmem:[#allocation5 + $0x120] sm:$0xff]  ;;  %v152_v33 = vld [vmem:[#allocation5 + $0x128] sm:$0xff]  ;;  %v1869_v34 = vpack.c.bf16 %v120_v31, %v119_v29  ;;  %v138_v36 = vld [vmem:[#allocation5 + $0xb8] sm:$0xff] }
  0x53   :  { %1866 = vmatpush3.bf16.msra.mxu0 %v1865_v21  ;;  %v169_v37 = vld [vmem:[#allocation5 + $0x1b0] sm:$0xff]  ;;  %v1901_v38 = vpack.c.bf16 %v152_v33, %v151_v32  ;;  %v1871_v39 = vpack.c.bf16 %v138_v36, %v137_v35  ;;  %v170_v40 = vld [vmem:[#allocation5 + $0x1b8] sm:$0xff]  ;;  %v139_v46 = vld [vmem:[#allocation5 + $0xc0] sm:$0xff] }
  0x54   :  { %1898 = vmatpush3.bf16.msra.mxu1 %v1897_v25  ;;  %1868 = vmatprep.subr.bf16.mxu0 %v1867_v26  ;;  %v121_v41 = vld [vmem:[#allocation5 + $0x30] sm:$0xff]  ;;  %v122_v42 = vld [vmem:[#allocation5 + $0x38] sm:$0xff]  ;;  %v1903_v43 = vpack.c.bf16 %v170_v40, %v169_v37  ;;  %v140_v47 = vld [vmem:[#allocation5 + $0xc8] sm:$0xff] }
  0x55   :  { %1900 = vmatprep.subr.bf16.mxu1 %v1899_v30  ;;  %v153_v44 = vld [vmem:[#allocation5 + $0x130] sm:$0xff]  ;;  %v154_v45 = vld [vmem:[#allocation5 + $0x138] sm:$0xff]  ;;  %v171_v48 = vld [vmem:[#allocation5 + $0x1c0] sm:$0xff]  ;;  %v1873_v50 = vpack.c.bf16 %v122_v42, %v121_v41  ;;  %v1875_v52 = vpack.c.bf16 %v140_v47, %v139_v46 }
  0x56   :  { %v172_v49 = vld [vmem:[#allocation5 + $0x1c8] sm:$0xff]  ;;  %v1905_v51 = vpack.c.bf16 %v154_v45, %v153_v44  ;;  %v123_v53 = vld [vmem:[#allocation5 + $0x40] sm:$0xff]  ;;  %v141_v58 = vld [vmem:[#allocation5 + $0xd0] sm:$0xff]  ;;  %v2166_v45 = vmov 0.0|0.0  }
  0x57   :  { %1870 = vmatpush3.bf16.msra.mxu0 %v1869_v34  ;;  %v124_v54 = vld [vmem:[#allocation5 + $0x48] sm:$0xff]  ;;  %v155_v55 = vld [vmem:[#allocation5 + $0x140] sm:$0xff]  ;;  %v1907_v56 = vpack.c.bf16 %v172_v49, %v171_v48  ;;  %v142_v59 = vld [vmem:[#allocation5 + $0xd8] sm:$0xff] }
  0x58   :  { %1902 = vmatpush3.bf16.msra.mxu1 %v1901_v38  ;;  %1872 = vmatprep.subr.bf16.mxu0 %v1871_v39  ;;  %v156_v57 = vld [vmem:[#allocation5 + $0x148] sm:$0xff]  ;;  %v173_v60 = vld [vmem:[#allocation5 + $0x1d0] sm:$0xff]  ;;  %v174_v61 = vld [vmem:[#allocation5 + $0x1d8] sm:$0xff]  ;;  %v1877_v62 = vpack.c.bf16 %v124_v54, %v123_v53  ;;  %v1879_v0 = vpack.c.bf16 %v142_v59, %v141_v58 }
  0x59   :  { %1904 = vmatprep.subr.bf16.mxu1 %v1903_v43  ;;  %v1909_v63 = vpack.c.bf16 %v156_v57, %v155_v55  ;;  %v125_v1 = vld [vmem:[#allocation5 + $0x50] sm:$0xff]  ;;  %v126_v2 = vld [vmem:[#allocation5 + $0x58] sm:$0xff]  ;;  %v1911_v4 = vpack.c.bf16 %v174_v61, %v173_v60  ;;  %v143_v6 = vld [vmem:[#allocation5 + $0xe0] sm:$0xff] }
  0x5a   :  { %v157_v3 = vld [vmem:[#allocation5 + $0x150] sm:$0xff]  ;;  %v158_v5 = vld [vmem:[#allocation5 + $0x158] sm:$0xff]  ;;  %v144_v7 = vld [vmem:[#allocation5 + $0xe8] sm:$0xff]  ;;  %v1881_v10 = vpack.c.bf16 %v126_v2, %v125_v1 }
  0x5b   :  { %1874 = vmatpush3.bf16.msra.mxu0 %v1873_v50  ;;  %v175_v8 = vld [vmem:[#allocation5 + $0x1e0] sm:$0xff]  ;;  %v176_v9 = vld [vmem:[#allocation5 + $0x1e8] sm:$0xff]  ;;  %v1913_v13 = vpack.c.bf16 %v158_v5, %v157_v3  ;;  %v1883_v14 = vpack.c.bf16 %v144_v7, %v143_v6  ;;  %v78_v17 = vld [vmem:[#allocation3 + $0x18] sm:$0xff] }
  0x5c   :  { %1906 = vmatpush3.bf16.msra.mxu1 %v1905_v51  ;;  %1876 = vmatprep.subr.bf16.mxu0 %v1875_v52  ;;  %v127_v11 = vld [vmem:[#allocation5 + $0x60] sm:$0xff]  ;;  %v128_v12 = vld [vmem:[#allocation5 + $0x68] sm:$0xff]  ;;  %v1915_v18 = vpack.c.bf16 %v176_v9, %v175_v8  ;;  %v145_v20 = vld [vmem:[#allocation5 + $0xf0] sm:$0xff] }
  0x5d   :  { %1908 = vmatprep.subr.bf16.mxu1 %v1907_v56  ;;  %v159_v15 = vld [vmem:[#allocation5 + $0x160] sm:$0xff]  ;;  %v76_v16 = vld [vmem:[#allocation3 + $0x8] sm:$0xff]  ;;  %v146_v21 = vld [vmem:[#allocation5 + $0xf8] sm:$0xff]  ;;  %384 = vmatprep.mubr.f32.mxu1 %v78_v17  ;;  %v1885_v24 = vpack.c.bf16 %v128_v12, %v127_v11 }
  0x5e   :  { %v160_v19 = vld [vmem:[#allocation5 + $0x168] sm:$0xff]  ;;  %279 = vmatprep.mubr.f32.mxu0 %v76_v16  ;;  %v177_v22 = vld [vmem:[#allocation5 + $0x1f0] sm:$0xff]  ;;  %v178_v23 = vld [vmem:[#allocation5 + $0x1f8] sm:$0xff]  ;;  %v1887_v26 = vpack.c.bf16 %v146_v21, %v145_v20 }
  0x5f   :  { %1878 = vmatpush3.bf16.msra.mxu0 %v1877_v62  ;;  %v1917_v25 = vpack.c.bf16 %v160_v19, %v159_v15  ;;  %v129_v27 = vld [vmem:[#allocation5 + $0x70] sm:$0xff]  ;;  %v130_v28 = vld [vmem:[#allocation5 + $0x78] sm:$0xff]  ;;  %v1919_v30 = vpack.c.bf16 %v178_v23, %v177_v22  ;;  %v179_v32 = vld [vmem:[#allocation5 + $0x200] sm:$0xff] }
  0x60   :  { %1910 = vmatpush3.bf16.msra.mxu1 %v1909_v63  ;;  %1880 = vmatprep.subr.bf16.mxu0 %v1879_v0  ;;  %v161_v29 = vld [vmem:[#allocation5 + $0x170] sm:$0xff]  ;;  %v162_v31 = vld [vmem:[#allocation5 + $0x178] sm:$0xff]  ;;  %v180_v33 = vld [vmem:[#allocation5 + $0x208] sm:$0xff]  ;;  %v1889_v34 = vpack.c.bf16 %v130_v28, %v129_v27 }
  0x61   :  { %1912 = vmatprep.subr.bf16.mxu1 %v1911_v4  ;;  %v1921_v35 = vpack.c.bf16 %v162_v31, %v161_v29  ;;  %v1923_v36 = vpack.c.bf16 %v180_v33, %v179_v32  ;;  %v538_v37 = vld [vmem:[#allocation7] sm:$0xff]  ;;  %v539_v38 = vld [vmem:[#allocation7 + $0x8] sm:$0xff]  ;;  %v181_v40 = vld [vmem:[#allocation5 + $0x210] sm:$0xff] }
  0x62   :  { %v75_v39 = vld [vmem:[#allocation3] sm:$0xff]  ;;  %v182_v41 = vld [vmem:[#allocation5 + $0x218] sm:$0xff]  ;;  %v77_v42 = vld [vmem:[#allocation3 + $0x10] sm:$0xff]  ;;  %v2262_v43 = vpack.c.bf16 %v539_v38, %v538_v37 }
  0x63   :  { %1882 = vmatpush3.bf16.msra.mxu0 %v1881_v10  ;;  %v81_v44 = vld [vmem:[#allocation3 + $0x30] sm:$0xff]  ;;  %v83_v46 = vld [vmem:[#allocation3 + $0x40] sm:$0xff]  ;;  %v540_v47 = vld [vmem:[#allocation7 + $0x10] sm:$0xff]  ;;  %v1927_v49 = vpack.c.bf16 %v182_v41, %v181_v40 }
  0x64   :  { %1914 = vmatpush3.bf16.msra.mxu1 %v1913_v13  ;;  %1884 = vmatprep.subr.bf16.mxu0 %v1883_v14  ;;  %v541_v48 = vld [vmem:[#allocation7 + $0x18] sm:$0xff]  ;;  %v80_v50 = vld [vmem:[#allocation3 + $0x28] sm:$0xff]  ;;  %v183_v51 = vld [vmem:[#allocation5 + $0x220] sm:$0xff] }
  0x65   :  { %1916 = vmatprep.subr.bf16.mxu1 %v1915_v18  ;;  %v184_v52 = vld [vmem:[#allocation5 + $0x228] sm:$0xff]  ;;  %v82_v53 = vld [vmem:[#allocation3 + $0x38] sm:$0xff]  ;;  %v2266_v55 = vpack.c.bf16 %v541_v48, %v540_v47  ;;  %v85_v58 = vld [vmem:[#allocation3 + $0x50] sm:$0xff] }
  0x66   :  { %v86_v54 = vld [vmem:[#allocation3 + $0x58] sm:$0xff]  ;;  %v88_v56 = vld [vmem:[#allocation3 + $0x68] sm:$0xff]  ;;  %v1931_v57 = vpack.c.bf16 %v184_v52, %v183_v51  ;;  %v185_v59 = vld [vmem:[#allocation5 + $0x230] sm:$0xff] }
  0x67   :  { %1886 = vmatpush3.bf16.msra.mxu0 %v1885_v24  ;;  %v186_v60 = vld [vmem:[#allocation5 + $0x238] sm:$0xff]  ;;  %v87_v61 = vld [vmem:[#allocation3 + $0x60] sm:$0xff]  ;;  %v93_v63 = vld [vmem:[#allocation3 + $0x90] sm:$0xff] }
  0x68   :  { %1918 = vmatpush3.bf16.msra.mxu1 %v1917_v25  ;;  %1888 = vmatprep.subr.bf16.mxu0 %v1887_v26  ;;  %v91_v62 = vld [vmem:[#allocation3 + $0x80] sm:$0xff]  ;;  %v1935_v0 = vpack.c.bf16 %v186_v60, %v185_v59  ;;  %v90_v1 = vld [vmem:[#allocation3 + $0x78] sm:$0xff]  ;;  %v188_v3 = vld [vmem:[#allocation5 + $0x248] sm:$0xff]  ;;  %v2168_v25 = vmov 0.0  }
  0x69   :  { %1920 = vmatprep.subr.bf16.mxu1 %v1919_v30  ;;  %v187_v2 = vld [vmem:[#allocation5 + $0x240] sm:$0xff]  ;;  %v92_v4 = vld [vmem:[#allocation3 + $0x88] sm:$0xff]  ;;  %v98_v6 = vld [vmem:[#allocation3 + $0xb8] sm:$0xff] }
  0x6a   :  { %v96_v5 = vld [vmem:[#allocation3 + $0xa8] sm:$0xff]  ;;  %v1939_v7 = vpack.c.bf16 %v188_v3, %v187_v2  ;;  %v95_v8 = vld [vmem:[#allocation3 + $0xa0] sm:$0xff]  ;;  %v97_v9 = vld [vmem:[#allocation3 + $0xb0] sm:$0xff] }
  0x6b   :  { %1890 = vmatpush3.bf16.msra.mxu0 %v1889_v34  ;;  %v101_v10 = vld [vmem:[#allocation3 + $0xd0] sm:$0xff]  ;;  %v103_v11 = vld [vmem:[#allocation3 + $0xe0] sm:$0xff]  ;;  %v100_v12 = vld [vmem:[#allocation3 + $0xc8] sm:$0xff] }
  0x6c   :  { %1922 = vmatpush3.bf16.msra.mxu1 %v1921_v35  ;;  %1924 = vmatprep.subr.bf16.mxu0 %v1923_v36  ;;  %v189_v13 = vld [vmem:[#allocation5 + $0x250] sm:$0xff]  ;;  %v102_v14 = vld [vmem:[#allocation3 + $0xd8] sm:$0xff]  ;;  %v108_v16 = vld [vmem:[#allocation3 + $0x108] sm:$0xff] }
  0x6d   :  { %1943 = vmatprep.subr.bf16.mxu1 %v2166_v45  ;;  %v106_v15 = vld [vmem:[#allocation3 + $0xf8] sm:$0xff]  ;;  %v105_v17 = vld [vmem:[#allocation3 + $0xf0] sm:$0xff]  ;;  %v107_v18 = vld [vmem:[#allocation3 + $0x100] sm:$0xff] }
  0x6e   :  { %280 = vmatmul.mubr.f32.vlgmr.msra.gmra.mrb[0].mxu0 %v75_v39  ;;  %v111_v19 = vld [vmem:[#allocation3 + $0x120] sm:$0xff]  ;;  %v113_v20 = vld [vmem:[#allocation3 + $0x130] sm:$0xff]  ;;  %v110_v21 = vld [vmem:[#allocation3 + $0x118] sm:$0xff] }
  0x6f   :  { %385 = vmatmul.mubr.f32.vlgmr.msra.gmra.mrb[0].mxu1 %v77_v42  ;;  %284 = vmatprep.mubr.f32.mxu0 %v81_v44  ;;  %v112_v22 = vld [vmem:[#allocation3 + $0x128] sm:$0xff]  ;;  %v79_v23 = vld [vmem:[#allocation3 + $0x20] sm:$0xff]  ;;  %v89_v26 = vld [vmem:[#allocation3 + $0x70] sm:$0xff] }
  0x70   :  { %1945 = vmatpush3.bf16.msra.mxu1 %v2262_v43  ;;  %389 = vmatprep.mubr.f32.mxu1 %v83_v46  ;;  %v84_v24 = vld [vmem:[#allocation3 + $0x48] sm:$0xff]  ;;  %v94_v27 = vld [vmem:[#allocation3 + $0x98] sm:$0xff]  ;;  %v99_v28 = vld [vmem:[#allocation3 + $0xc0] sm:$0xff] }
  0x71   :  { %1926 = vmatpush3.bf16.msra.mxu0 %v1923_v36  ;;  %1946 = vmatprep.subr.bf16.mxu1 %v2166_v45  ;;  %v104_v29 = vld [vmem:[#allocation3 + $0xe8] sm:$0xff]  ;;  %v109_v30 = vld [vmem:[#allocation3 + $0x110] sm:$0xff]  ;;  %v114_v31 = vld [vmem:[#allocation3 + $0x138] sm:$0xff] }
  0x72   :  { %285 = vmatmul.mubr.f32.gmra.mrb[2].mxu0 %v80_v50  ;;  %1928 = vmatprep.subr.bf16.mxu0 %v1927_v49 }
  0x73   :  { %390 = vmatmul.mubr.f32.gmra.mrb[2].mxu1 %v82_v53  ;;  %289 = vmatprep.mubr.f32.mxu0 %v86_v54 }
  0x74   :  { %394 = vmatprep.mubr.f32.mxu1 %v88_v56  ;;  %1948 = vmatpush3.bf16.msra.mxu1 %v2266_v55 }
  0x75   :  { %1930 = vmatpush3.bf16.msra.mxu0 %v1927_v49  ;;  %1949 = vmatprep.subr.bf16.mxu1 %v2166_v45 }
  0x76   :  { %290 = vmatmul.mubr.f32.gmra.mrb[4].mxu0 %v85_v58  ;;  %1932 = vmatprep.subr.bf16.mxu0 %v1931_v57 }
  0x77   :  { %395 = vmatmul.mubr.f32.gmra.mrb[4].mxu1 %v87_v61  ;;  %294 = vmatprep.mubr.f32.mxu0 %v91_v62 }
  0x78   :  { %399 = vmatprep.mubr.f32.mxu1 %v93_v63 }
  0x79   :  { %1934 = vmatpush3.bf16.msra.mxu0 %v1931_v57 }
  0x7a   :  { %295 = vmatmul.mubr.f32.gmra.mrb[6].mxu0 %v90_v1  ;;  %1936 = vmatprep.subr.bf16.mxu0 %v1935_v0 }
  0x7b   :  { %400 = vmatmul.mubr.f32.gmra.mrb[6].mxu1 %v92_v4  ;;  %299 = vmatprep.mubr.f32.mxu0 %v96_v5 }
  0x7c   :  { %404 = vmatprep.mubr.f32.mxu1 %v98_v6 }
  0x7d   :  { %1938 = vmatpush3.bf16.msra.mxu0 %v1935_v0 }
  0x7e   :  { %300 = vmatmul.mubr.f32.gmra.mrb[8].mxu0 %v95_v8  ;;  %1940 = vmatprep.subr.bf16.mxu0 %v1939_v7 }
  0x7f   :  { %405 = vmatmul.mubr.f32.gmra.mrb[8].mxu1 %v97_v9  ;;  %304 = vmatprep.mubr.f32.mxu0 %v101_v10 }
  0x80   :  { %409 = vmatprep.mubr.f32.mxu1 %v103_v11 }
  0x81   :  { %1942 = vmatpush3.bf16.msra.mxu0 %v1939_v7 }
  0x82   :  { %305 = vmatmul.mubr.f32.gmra.mrb[10].mxu0 %v100_v12  ;;  %1757 = vmatprep.subr.mxu0 %v189_v13 }
  0x83   :  { %410 = vmatmul.mubr.f32.gmra.mrb[10].mxu1 %v102_v14  ;;  %309 = vmatprep.mubr.f32.mxu0 %v106_v15 }
  0x84   :  { %414 = vmatprep.mubr.f32.mxu1 %v108_v16 }
  0x85   :  { %1758 = vmatpush3.msra.mxu0 %v189_v13 }
  0x86   :  { %310 = vmatmul.mubr.f32.gmra.mrb[12].mxu0 %v105_v17  ;;  %1955 = vmatprep.subr.bf16.mxu0 %v2166_v45 }
  0x87   :  { %415 = vmatmul.mubr.f32.gmra.mrb[12].mxu1 %v107_v18  ;;  %314 = vmatprep.mubr.f32.mxu0 %v111_v19 }
  0x88   :  { %419 = vmatprep.mubr.f32.mxu1 %v113_v20 }
  0x8a   :  { %315 = vmatmul.mubr.f32.gmra.mrb[14].mxu0 %v110_v21 }
  0x8b   :  { %420 = vmatmul.mubr.f32.gmra.mrb[14].mxu1 %v112_v22  ;;  %1759 = vmatprep.mubr.msk.f32.mxu0 %vm190_vm0, %v79_v23 }
  0x8c   :  { %1779 = vmatprep.mubr.msk.f32.mxu1 %vm2167_vm1, %v2168_v25 }
  0x8e   :  { %1760 = vmatmul.mubr.msk.f32.vlgmr.msra.gmra.mrb[16].mxu0 %vm190_vm0, %v84_v24 }
  0x8f   :  { %1780 = vmatmul.mubr.f32.vlgmr.msra.gmra.mrb[16].mxu1 %v2168_v25  ;;  %1762 = vmatprep.mubr.msk.f32.mxu0 %vm190_vm0, %v89_v26 }
  0x90   :  { %1951 = vmatpush3.bf16.msra.mxu1 %v2262_v43  ;;  %1790 = vmatprep.mubr.msk.f32.mxu1 %vm2167_vm1, %v2168_v25 }
  0x91   :  { %1952 = vmatprep.subr.bf16.mxu1 %v2166_v45  ;;  %1957 = vmatpush3.bf16.msra.mxu0 %v2262_v43 }
  0x92   :  { %1763 = vmatmul.mubr.msk.f32.gmra.mrb[18].mxu0 %vm190_vm0, %v94_v27  ;;  %1958 = vmatprep.subr.bf16.mxu0 %v2166_v45 }
  0x93   :  { %1765 = vmatprep.mubr.msk.f32.mxu0 %vm190_vm0, %v99_v28 }
  0x94   :  { %1954 = vmatpush3.bf16.msra.mxu1 %v2266_v55 }
  0x95   :  { %1960 = vmatpush3.bf16.msra.mxu0 %v2266_v55  ;;  %1961 = vmatprep.subr.bf16.mxu1 %v2166_v45 }
  0x96   :  { %1766 = vmatmul.mubr.msk.f32.gmra.mrb[20].mxu0 %vm190_vm0, %v104_v29  ;;  %1967 = vmatprep.subr.bf16.mxu0 %v2166_v45 }
  0x97   :  { %1768 = vmatprep.mubr.msk.f32.mxu0 %vm190_vm0, %v109_v30 }
  0x9a   :  { %1769 = vmatmul.mubr.msk.f32.gmra.mrb[22].mxu0 %vm190_vm0, %v114_v31 }
  0x9b   :  { %1801 = vmatprep.mubr.msk.f32.mxu0 %vm2167_vm1, %v2168_v25 }
 0x141   :  { %v1598_v32 = vpop.f32.mrb[0].mxu0 }
 0x142   :  { %v1654_v33 = vpop.f32.mrb[0].mxu1  ;;  %v1599_v34 = vpop.f32.mrb[1].mxu0 }
 0x143   :  { %v1600_v35 = vadd.f32 %v1599_v34, %v1598_v32  ;;  %v1655_v36 = vpop.f32.mrb[1].mxu1 }
 0x144   :  { %v1656_v37 = vadd.f32 %v1655_v36, %v1654_v33 }
 0x145   :  { %v1601_v38 = vpop.f32.mrb[2].mxu0 }
 0x146   :  { %v1657_v39 = vpop.f32.mrb[2].mxu1  ;;  %v1602_v40 = vpop.f32.mrb[3].mxu0  ;;  %v387_v41 = vadd.f32 %v1656_v37, %v1600_v35 }
 0x147   :  { %v1603_v42 = vadd.f32 %v1602_v40, %v1601_v38  ;;  %v1658_v44 = vpop.f32.mrb[3].mxu1 }
 0x148   :  { %v1659_v46 = vadd.f32 %v1658_v44, %v1657_v39 }
 0x149   :  { %v1604_v47 = vpop.f32.mrb[4].mxu0 }
 0x14a   :  { %v1660_v48 = vpop.f32.mrb[4].mxu1  ;;  %v1605_v49 = vpop.f32.mrb[5].mxu0  ;;  %v392_v50 = vadd.f32 %v1659_v46, %v1603_v42 }
 0x14b   :  { %v1606_v51 = vadd.f32 %v1605_v49, %v1604_v47  ;;  %v1661_v52 = vpop.f32.mrb[5].mxu1 }
 0x14c   :  { %v1662_v53 = vadd.f32 %v1661_v52, %v1660_v48 }
 0x14d   :  { %v1607_v54 = vpop.f32.mrb[6].mxu0 }
 0x14e   :  { %v1663_v56 = vpop.f32.mrb[6].mxu1  ;;  %v1608_v57 = vpop.f32.mrb[7].mxu0  ;;  %v397_v58 = vadd.f32 %v1662_v53, %v1606_v51 }
 0x14f   :  { %v1609_v59 = vadd.f32 %v1608_v57, %v1607_v54  ;;  %v1664_v60 = vpop.f32.mrb[7].mxu1 }
 0x150   :  { %v1665_v61 = vadd.f32 %v1664_v60, %v1663_v56 }
 0x151   :  { %v1610_v62 = vpop.f32.mrb[8].mxu0 }
 0x152   :  { %v1666_v63 = vpop.f32.mrb[8].mxu1  ;;  %v1611_v0 = vpop.f32.mrb[9].mxu0  ;;  %v402_v1 = vadd.f32 %v1665_v61, %v1609_v59 }
 0x153   :  { %v1612_v2 = vadd.f32 %v1611_v0, %v1610_v62  ;;  %v1667_v3 = vpop.f32.mrb[9].mxu1 }
 0x154   :  { %v1668_v4 = vadd.f32 %v1667_v3, %v1666_v63 }
 0x155   :  { %v1613_v5 = vpop.f32.mrb[10].mxu0 }
 0x156   :  { %v1669_v6 = vpop.f32.mrb[10].mxu1  ;;  %v1614_v7 = vpop.f32.mrb[11].mxu0  ;;  %v407_v8 = vadd.f32 %v1668_v4, %v1612_v2 }
 0x157   :  { %v1615_v9 = vadd.f32 %v1614_v7, %v1613_v5  ;;  %v1670_v10 = vpop.f32.mrb[11].mxu1 }
 0x158   :  { %v1671_v11 = vadd.f32 %v1670_v10, %v1669_v6 }
 0x159   :  { %v1616_v12 = vpop.f32.mrb[12].mxu0 }
 0x15a   :  { %v1672_v13 = vpop.f32.mrb[12].mxu1  ;;  %v1617_v14 = vpop.f32.mrb[13].mxu0  ;;  %v412_v15 = vadd.f32 %v1671_v11, %v1615_v9 }
 0x15b   :  { %v1618_v16 = vadd.f32 %v1617_v14, %v1616_v12  ;;  %v1673_v17 = vpop.f32.mrb[13].mxu1 }
 0x15c   :  { %v1674_v18 = vadd.f32 %v1673_v17, %v1672_v13 }
 0x15d   :  { %v1619_v19 = vpop.f32.mrb[14].mxu0 }
 0x15e   :  { %v1675_v20 = vpop.f32.mrb[14].mxu1  ;;  %v1620_v21 = vpop.f32.mrb[15].mxu0  ;;  %v417_v22 = vadd.f32 %v1674_v18, %v1618_v16 }
 0x15f   :  { %v1621_v23 = vadd.f32 %v1620_v21, %v1619_v19  ;;  %v1676_v24 = vpop.f32.mrb[15].mxu1 }
 0x160   :  { %v1677_v26 = vadd.f32 %v1676_v24, %v1675_v20 }
 0x161   :  { %v1761_v27 = vpop.f32.mrb[16].mxu0 }
 0x162   :  { %v2295_v28 = vadd.f32 %v1761_v27, %v392_v50  ;;  %v613_v29 = vpop.f32.mrb[16].mxu1  ;;  %v491_v30 = vpop.f32.mrb[17].mxu0  ;;  %v422_v31 = vadd.f32 %v1677_v26, %v1621_v23 }
 0x163   :  { %625 = vrot.lane.b32.xlu0 %v613_v29, %s2169_s3  ;;  %v492_v32 = vadd.f32 %v491_v30, %v387_v41  ;;  %v1781_v33 = vpop.f32.mrb[17].mxu1 }
 0x165   :  { %v1764_v34 = vpop.f32.mrb[18].mxu0  ;;  %v617_v41 = vadd.f32 %v613_v29, %v492_v32 }
 0x166   :  { %v2298_v35 = vadd.f32 %v1764_v34, %v402_v1  ;;  %v501_v36 = vpop.f32.mrb[19].mxu0 }
 0x167   :  { %v2300_v37 = vadd.f32 %v501_v36, %v397_v58  ;;  %v1549_v49 = vmul.f32 -1.442695, %v617_v41 }
 0x169   :  { %v1767_v38 = vpop.f32.mrb[20].mxu0  ;;  %2014 = vpow2.f32 %v1549_v49 }
 0x16a   :  { %v2302_v39 = vadd.f32 %v1767_v38, %v412_v15  ;;  %v511_v40 = vpop.f32.mrb[21].mxu0 }
 0x16b   :  { %v2304_v42 = vadd.f32 %v511_v40, %v407_v8 }
 0x16d   :  { %v1770_v44 = vpop.f32.mrb[22].mxu0 }
 0x16e   :  { %v2306_v46 = vadd.f32 %v1770_v44, %v422_v31  ;;  %v521_v47 = vpop.f32.mrb[23].mxu0 }
 0x16f   :  { %v2308_v48 = vadd.f32 %v521_v47, %v417_v22 }
 0x173   :  { %v2015_v50 = vpop.eup %2014 }
 0x174   :  { %v621_v51 = vadd.f32 1.0, %v2015_v50 }
 0x176   :  { %2016 = vrcp.f32 %v621_v51 }
 0x180   :  { %v2017_v52 = vpop.eup %2016 }
 0x181   :  { %v635_v59 = vsub.f32 1.0, %v2017_v52  ;;  %v641_v61 = vmul.f32 0.0, %v2017_v52 }
 0x1d5   :  { %v626_v53 = vpop.permute.xlu0 %625 }
 0x1d6   :  { %v628_v54 = vmul.f32 %v2017_v52, %v626_v53 }
 0x1d8   :  { %630 = vrot.lane.b32.xlu0 %v628_v54, %s2169_s3 }
 0x24a   :  { %v631_v56 = vpop.permute.xlu0 %630 }
 0x24b   :  { %v633_v57 = vadd.f32 %v631_v56, %v492_v32 }
 0x24d   :  { %2018 = vtanh.f32 %v633_v57 }
 0x257   :  { %v2019_v58 = vpop.eup %2018 }
 0x258   :  { %637 = vrot.lane.b32.xlu1 %v2019_v58, %s2170_s18 }
 0x2ca   :  { %v638_v60 = vpop.permute.xlu1 %637 }
 0x2cb   :  { %v640_v62 = vmul.f32 %v638_v60, %v635_v59 }
 0x2cd   :  { %v642_v63 = vadd.f32 %v641_v61, %v640_v62 }
 0x2cf   :  { %646 = vrot.lane.b32.xlu1 %v642_v63, %s2170_s18 }
 0x341   :  { %v647_v0 = vpop.permute.xlu1 %646 }
 0x342   :  { %1791 = vmatmul.mubr.msk.f32.vlgmr.msra.gmra.mrb[18].mxu1 %vm543_vm2, %v647_v0 }
 0x343   :  { %1963 = vmatpush3.bf16.msra.mxu1 %v2262_v43  ;;  %1812 = vmatprep.mubr.msk.f32.mxu1 %vm2167_vm1, %v2168_v25 }
 0x344   :  { %1964 = vmatprep.subr.bf16.mxu1 %v2166_v45 }
 0x347   :  { %1966 = vmatpush3.bf16.msra.mxu1 %v2266_v55 }
 0x348   :  { %1973 = vmatprep.subr.bf16.mxu1 %v2166_v45 }
 0x415   :  { %v716_v1 = vpop.f32.mrb[18].mxu1 }
 0x416   :  { %728 = vrot.lane.b32.xlu0 %v716_v1, %s2169_s3  ;;  %v1792_v2 = vpop.f32.mrb[19].mxu1  ;;  %v720_v3 = vadd.f32 %v716_v1, %v2295_v28 }
 0x418   :  { %v1551_v4 = vmul.f32 -1.442695, %v720_v3 }
 0x41a   :  { %2020 = vpow2.f32 %v1551_v4 }
 0x424   :  { %v2021_v5 = vpop.eup %2020 }
 0x425   :  { %v724_v6 = vadd.f32 1.0, %v2021_v5 }
 0x427   :  { %2022 = vrcp.f32 %v724_v6 }
 0x431   :  { %v2023_v7 = vpop.eup %2022 }
 0x432   :  { %v738_v13 = vsub.f32 1.0, %v2023_v7  ;;  %v744_v15 = vmul.f32 %v2023_v7, %v642_v63 }
 0x488   :  { %v729_v8 = vpop.permute.xlu0 %728 }
 0x489   :  { %v731_v9 = vmul.f32 %v2023_v7, %v729_v8 }
 0x48b   :  { %733 = vrot.lane.b32.xlu1 %v731_v9, %s2169_s3 }
 0x4fd   :  { %v734_v10 = vpop.permute.xlu1 %733 }
 0x4fe   :  { %v736_v11 = vadd.f32 %v734_v10, %v2295_v28 }
 0x500   :  { %2024 = vtanh.f32 %v736_v11 }
 0x50a   :  { %v2025_v12 = vpop.eup %2024 }
 0x50b   :  { %740 = vrot.lane.b32.xlu0 %v2025_v12, %s2170_s18 }
 0x57d   :  { %v741_v14 = vpop.permute.xlu0 %740 }
 0x57e   :  { %v743_v16 = vmul.f32 %v741_v14, %v738_v13 }
 0x580   :  { %v745_v17 = vadd.f32 %v744_v15, %v743_v16 }
 0x582   :  { %749 = vrot.lane.b32.xlu1 %v745_v17, %s2170_s18 }
 0x5f4   :  { %v750_v18 = vpop.permute.xlu1 %749 }
 0x5f5   :  { %1802 = vmatmul.mubr.msk.f32.vlgmr.msra.gmra.mrb[24].mxu0 %vm543_vm2, %v750_v18 }
 0x5f6   :  { %1969 = vmatpush3.bf16.msra.mxu0 %v2262_v43  ;;  %1823 = vmatprep.mubr.msk.f32.mxu0 %vm2167_vm1, %v2168_v25 }
 0x5f7   :  { %1970 = vmatprep.subr.bf16.mxu0 %v2166_v45 }
 0x5fa   :  { %1972 = vmatpush3.bf16.msra.mxu0 %v2266_v55 }
 0x5fb   :  { %1979 = vmatprep.subr.bf16.mxu0 %v2166_v45 }
 0x6c8   :  { %v819_v19 = vpop.f32.mrb[24].mxu0 }
 0x6c9   :  { %831 = vrot.lane.b32.xlu0 %v819_v19, %s2169_s3  ;;  %v1803_v20 = vpop.f32.mrb[25].mxu0  ;;  %v823_v21 = vadd.f32 %v819_v19, %v2300_v37 }
 0x6cb   :  { %v1553_v22 = vmul.f32 -1.442695, %v823_v21 }
 0x6cd   :  { %2026 = vpow2.f32 %v1553_v22 }
 0x6d7   :  { %v2027_v23 = vpop.eup %2026 }
 0x6d8   :  { %v827_v24 = vadd.f32 1.0, %v2027_v23 }
 0x6da   :  { %2028 = vrcp.f32 %v827_v24 }
 0x6e4   :  { %v2029_v26 = vpop.eup %2028 }
 0x6e5   :  { %v841_v32 = vsub.f32 1.0, %v2029_v26  ;;  %v847_v34 = vmul.f32 %v2029_v26, %v745_v17 }
 0x73b   :  { %v832_v27 = vpop.permute.xlu0 %831 }
 0x73c   :  { %v834_v28 = vmul.f32 %v2029_v26, %v832_v27 }
 0x73e   :  { %836 = vrot.lane.b32.xlu1 %v834_v28, %s2169_s3 }
 0x7b0   :  { %v837_v29 = vpop.permute.xlu1 %836 }
 0x7b1   :  { %v839_v30 = vadd.f32 %v837_v29, %v2300_v37 }
 0x7b3   :  { %2030 = vtanh.f32 %v839_v30 }
 0x7bd   :  { %v2031_v31 = vpop.eup %2030 }
 0x7be   :  { %843 = vrot.lane.b32.xlu0 %v2031_v31, %s2170_s18 }
 0x830   :  { %v844_v33 = vpop.permute.xlu0 %843 }
 0x831   :  { %v846_v36 = vmul.f32 %v844_v33, %v841_v32 }
 0x833   :  { %v848_v38 = vadd.f32 %v847_v34, %v846_v36 }
 0x835   :  { %852 = vrot.lane.b32.xlu1 %v848_v38, %s2170_s18 }
 0x8a7   :  { %v853_v40 = vpop.permute.xlu1 %852 }
 0x8a8   :  { %1813 = vmatmul.mubr.msk.f32.vlgmr.msra.gmra.mrb[20].mxu1 %vm543_vm2, %v853_v40 }
 0x8a9   :  { %1975 = vmatpush3.bf16.msra.mxu1 %v2262_v43  ;;  %1834 = vmatprep.mubr.msk.f32.mxu1 %vm2167_vm1, %v2168_v25 }
 0x8aa   :  { %1976 = vmatprep.subr.bf16.mxu1 %v2166_v45 }
 0x8ad   :  { %1978 = vmatpush3.bf16.msra.mxu1 %v2266_v55 }
 0x8ae   :  { %1985 = vmatprep.subr.bf16.mxu1 %v2166_v45 }
 0x97b   :  { %v922_v37 = vpop.f32.mrb[20].mxu1 }
 0x97c   :  { %934 = vrot.lane.b32.xlu0 %v922_v37, %s2169_s3  ;;  %v1814_v44 = vpop.f32.mrb[21].mxu1  ;;  %v926_v47 = vadd.f32 %v922_v37, %v2298_v35 }
 0x97e   :  { %v1555_v41 = vmul.f32 -1.442695, %v926_v47 }
 0x980   :  { %2032 = vpow2.f32 %v1555_v41 }
 0x98a   :  { %v2033_v49 = vpop.eup %2032 }
 0x98b   :  { %v930_v50 = vadd.f32 1.0, %v2033_v49 }
 0x98d   :  { %2034 = vrcp.f32 %v930_v50 }
 0x997   :  { %v2035_v51 = vpop.eup %2034 }
 0x998   :  { %v944_v58 = vsub.f32 1.0, %v2035_v51  ;;  %v950_v60 = vmul.f32 %v2035_v51, %v848_v38 }
 0x9ee   :  { %v935_v52 = vpop.permute.xlu0 %934 }
 0x9ef   :  { %v937_v53 = vmul.f32 %v2035_v51, %v935_v52 }
 0x9f1   :  { %939 = vrot.lane.b32.xlu1 %v937_v53, %s2169_s3 }
 0xa63   :  { %v940_v54 = vpop.permute.xlu1 %939 }
 0xa64   :  { %v942_v56 = vadd.f32 %v940_v54, %v2298_v35 }
 0xa66   :  { %2036 = vtanh.f32 %v942_v56 }
 0xa70   :  { %v2037_v57 = vpop.eup %2036 }
 0xa71   :  { %946 = vrot.lane.b32.xlu0 %v2037_v57, %s2170_s18 }
 0xae3   :  { %v947_v59 = vpop.permute.xlu0 %946 }
 0xae4   :  { %v949_v61 = vmul.f32 %v947_v59, %v944_v58 }
 0xae6   :  { %v951_v62 = vadd.f32 %v950_v60, %v949_v61 }
 0xae8   :  { %955 = vrot.lane.b32.xlu1 %v951_v62, %s2170_s18 }
 0xb5a   :  { %v956_v63 = vpop.permute.xlu1 %955 }
 0xb5b   :  { %1824 = vmatmul.mubr.msk.f32.vlgmr.msra.gmra.mrb[26].mxu0 %vm543_vm2, %v956_v63 }
 0xb5c   :  { %1981 = vmatpush3.bf16.msra.mxu0 %v2262_v43  ;;  %1845 = vmatprep.mubr.msk.f32.mxu0 %vm2167_vm1, %v2168_v25 }
 0xb5d   :  { %1982 = vmatprep.subr.bf16.mxu0 %v2166_v45 }
 0xb60   :  { %1984 = vmatpush3.bf16.msra.mxu0 %v2266_v55 }
 0xc2e   :  { %v1025_v35 = vpop.f32.mrb[26].mxu0 }
 0xc2f   :  { %1037 = vrot.lane.b32.xlu0 %v1025_v35, %s2169_s3  ;;  %v1825_v0 = vpop.f32.mrb[27].mxu0  ;;  %v1029_v1 = vadd.f32 %v1025_v35, %v2304_v42 }
 0xc31   :  { %v1557_v2 = vmul.f32 -1.442695, %v1029_v1  ;;  %v1365_v1 = vld [vmem:[#allocation8 + $0x8] sm:$0xff] }
 0xc33   :  { %2038 = vpow2.f32 %v1557_v2  ;;  %v1367_v2 = vld [vmem:[#allocation8 + $0x18] sm:$0xff] }
 0xc3d   :  { %v2039_v3 = vpop.eup %2038 }
 0xc3e   :  { %v1033_v4 = vadd.f32 1.0, %v2039_v3  ;;  %v1364_v3 = vld [vmem:[#allocation8] sm:$0xff] }
 0xc40   :  { %2040 = vrcp.f32 %v1033_v4  ;;  %v1991_v4 = vpack.c.bf16 %v1367_v2, %v1365_v1 }
 0xc42   :  { %1992 = vmatprep.subr.bf16.mxu0 %v1991_v4 }
 0xc4a   :  { %v2041_v5 = vpop.eup %2040 }
 0xc4b   :  { %v1047_v11 = vsub.f32 1.0, %v2041_v5  ;;  %v1053_v13 = vmul.f32 %v2041_v5, %v951_v62 }
 0xca1   :  { %v1038_v6 = vpop.permute.xlu0 %1037 }
 0xca2   :  { %v1040_v7 = vmul.f32 %v2041_v5, %v1038_v6  ;;  %v1366_v5 = vld [vmem:[#allocation8 + $0x10] sm:$0xff]  ;;  %v1369_v6 = vld [vmem:[#allocation8 + $0x28] sm:$0xff] }
 0xca4   :  { %1042 = vrot.lane.b32.xlu1 %v1040_v7, %s2169_s3  ;;  %v1371_v7 = vld [vmem:[#allocation8 + $0x38] sm:$0xff] }
 0xd16   :  { %v1043_v8 = vpop.permute.xlu1 %1042 }
 0xd17   :  { %v1045_v9 = vadd.f32 %v1043_v8, %v2304_v42  ;;  %v1993_v8 = vpack.c.bf16 %v1366_v5, %v1364_v3 }
 0xd19   :  { %2042 = vtanh.f32 %v1045_v9  ;;  %v1995_v9 = vpack.c.bf16 %v1371_v7, %v1369_v6 }
 0xd23   :  { %v2043_v10 = vpop.eup %2042 }
 0xd24   :  { %1049 = vrot.lane.b32.xlu0 %v2043_v10, %s2170_s18  ;;  %v1368_v10 = vld [vmem:[#allocation8 + $0x20] sm:$0xff] }
 0xd96   :  { %v1050_v12 = vpop.permute.xlu0 %1049 }
 0xd97   :  { %v1052_v14 = vmul.f32 %v1050_v12, %v1047_v11  ;;  %v1370_v11 = vld [vmem:[#allocation8 + $0x30] sm:$0xff] }
 0xd98   :  { %v1997_v12 = vpack.c.bf16 %v1370_v11, %v1368_v10 }
 0xd99   :  { %v1054_v15 = vadd.f32 %v1053_v13, %v1052_v14 }
 0xd9b   :  { %1058 = vrot.lane.b32.xlu1 %v1054_v15, %s2170_s18 }
 0xe0d   :  { %v1059_v16 = vpop.permute.xlu1 %1058 }
 0xe0e   :  { %1835 = vmatmul.mubr.msk.f32.vlgmr.msra.gmra.mrb[22].mxu1 %vm543_vm2, %v1059_v16 }
 0xe0f   :  { %1987 = vmatpush3.bf16.msra.mxu1 %v2262_v43  ;;  %1856 = vmatprep.mubr.msk.f32.mxu1 %vm2167_vm1, %v2168_v25 }
 0xe10   :  { %1988 = vmatprep.subr.bf16.mxu1 %v2166_v45 }
 0xe13   :  { %1990 = vmatpush3.bf16.msra.mxu1 %v2266_v55 }
 0xee1   :  { %v1128_v42 = vpop.f32.mrb[22].mxu1 }
 0xee2   :  { %1140 = vrot.lane.b32.xlu0 %v1128_v42, %s2169_s3  ;;  %v1836_v17 = vpop.f32.mrb[23].mxu1  ;;  %v1132_v18 = vadd.f32 %v1128_v42, %v2302_v39 }
 0xee4   :  { %v1559_v19 = vmul.f32 -1.442695, %v1132_v18  ;;  %v1565_v18 = vld.sshfl [vmem:[%s2402_s4] sm:$0x33 pattern:$0x76325410] }
 0xee6   :  { %2044 = vpow2.f32 %v1559_v19  ;;  %v1459_v19 = vcombine.high %v1565_v18, %v1565_v18 }
 0xee8   :  { %1462 = vmatprep.subr.mxu1 %v1459_v19 }
 0xef0   :  { %v2045_v20 = vpop.eup %2044 }
 0xef1   :  { %v1136_v21 = vadd.f32 1.0, %v2045_v20 }
 0xef3   :  { %2046 = vrcp.f32 %v1136_v21 }
 0xefd   :  { %v2047_v22 = vpop.eup %2046 }
 0xefe   :  { %v1150_v26 = vsub.f32 1.0, %v2047_v22  ;;  %v1156_v28 = vmul.f32 %v2047_v22, %v1054_v15 }
 0xf54   :  { %v1141_v43 = vpop.permute.xlu0 %1140 }
 0xf55   :  { %v1143_v23 = vmul.f32 %v2047_v22, %v1141_v43 }
 0xf57   :  { %1145 = vrot.lane.b32.xlu1 %v1143_v23, %s2169_s3 }
 0xfc9   :  { %v1146_v24 = vpop.permute.xlu1 %1145 }
 0xfca   :  { %v1148_v45 = vadd.f32 %v1146_v24, %v2302_v39 }
 0xfcc   :  { %2048 = vtanh.f32 %v1148_v45 }
 0xfd6   :  { %v2049_v55 = vpop.eup %2048 }
 0xfd7   :  { %1152 = vrot.lane.b32.xlu0 %v2049_v55, %s2170_s18 }
0x1049   :  { %v1153_v27 = vpop.permute.xlu0 %1152 }
0x104a   :  { %v1155_v29 = vmul.f32 %v1153_v27, %v1150_v26 }
0x104c   :  { %v1157_v30 = vadd.f32 %v1156_v28, %v1155_v29 }
0x104e   :  { %1161 = vrot.lane.b32.xlu1 %v1157_v30, %s2170_s18 }
0x10c0   :  { %v1162_v31 = vpop.permute.xlu1 %1161 }
0x10c1   :  { %1846 = vmatmul.mubr.msk.f32.vlgmr.msra.gmra.mrb[28].mxu0 %vm543_vm2, %v1162_v31 }
0x10c2   :  { %1441 = vmatprep.mubr.f32.mxu0 %v2168_v25  ;;  %1994 = vmatpush1.bf16.msra.mxu0 %v1993_v8 }
0x10c3   :  { %1996 = vmatprep.subr.bf16.mxu0 %v1995_v9 }
0x10c6   :  { %1998 = vmatpush1.bf16.msra.mxu0 %v1997_v12 }
0x1194   :  { %v1231_v32 = vpop.f32.mrb[28].mxu0 }
0x1195   :  { %1243 = vrot.lane.b32.xlu0 %v1231_v32, %s2169_s3  ;;  %v1847_v39 = vpop.f32.mrb[29].mxu0  ;;  %v1235_v33 = vadd.f32 %v1231_v32, %v2308_v48 }
0x1197   :  { %v1561_v34 = vmul.f32 -1.442695, %v1235_v33 }
0x1199   :  { %2050 = vpow2.f32 %v1561_v34 }
0x11a3   :  { %v2051_v36 = vpop.eup %2050 }
0x11a4   :  { %v1239_v38 = vadd.f32 1.0, %v2051_v36 }
0x11a6   :  { %2052 = vrcp.f32 %v1239_v38 }
0x11b0   :  { %v2053_v40 = vpop.eup %2052 }
0x11b1   :  { %v1253_v49 = vsub.f32 1.0, %v2053_v40  ;;  %v1259_v51 = vmul.f32 %v2053_v40, %v1157_v30 }
0x1207   :  { %v1244_v37 = vpop.permute.xlu0 %1243 }
0x1208   :  { %v1246_v44 = vmul.f32 %v2053_v40, %v1244_v37 }
0x120a   :  { %1248 = vrot.lane.b32.xlu1 %v1246_v44, %s2169_s3 }
0x127c   :  { %v1249_v47 = vpop.permute.xlu1 %1248 }
0x127d   :  { %v1251_v41 = vadd.f32 %v1249_v47, %v2308_v48 }
0x127f   :  { %2054 = vtanh.f32 %v1251_v41 }
0x1289   :  { %v2055_v25 = vpop.eup %2054 }
0x128a   :  { %1255 = vrot.lane.b32.xlu0 %v2055_v25, %s2170_s18 }
0x12fc   :  { %v1256_v50 = vpop.permute.xlu0 %1255 }
0x12fd   :  { %v1258_v52 = vmul.f32 %v1256_v50, %v1253_v49 }
0x12ff   :  { %v1260_v53 = vadd.f32 %v1259_v51, %v1258_v52 }
0x1301   :  { %1264 = vrot.lane.b32.xlu1 %v1260_v53, %s2170_s18 }
0x1373   :  { %v1265_v54 = vpop.permute.xlu1 %1264 }
0x1374   :  { %1857 = vmatmul.mubr.msk.f32.vlgmr.msra.gmra.mrb[24].mxu1 %vm543_vm2, %v1265_v54 }
0x1375   :  { %1463 = vmatpush1.xpose.msra.mxu1 %v1565_v18 }
0x1447   :  { %v1334_v56 = vpop.f32.mrb[24].mxu1 }
0x1448   :  { %1346 = vrot.lane.b32.xlu0 %v1334_v56, %s2169_s3  ;;  %v1858_v57 = vpop.f32.mrb[25].mxu1  ;;  %v1338_v48 = vadd.f32 %v1334_v56, %v2306_v46 }
0x144a   :  { %v1563_v58 = vmul.f32 -1.442695, %v1338_v48 }
0x144c   :  { %2056 = vpow2.f32 %v1563_v58 }
0x1456   :  { %v2057_v59 = vpop.eup %2056 }
0x1457   :  { %v1342_v60 = vadd.f32 1.0, %v2057_v59 }
0x1459   :  { %2058 = vrcp.f32 %v1342_v60 }
0x1463   :  { %v2059_v61 = vpop.eup %2058 }
0x1464   :  { %v1362_v15 = vmul.f32 %v2059_v61, %v1260_v53 }
0x14ba   :  { %v1347_v62 = vpop.permute.xlu0 %1346 }
0x14bb   :  { %v1349_v63 = vmul.f32 %v2059_v61, %v1347_v62 }
0x14bd   :  { %1351 = vrot.lane.b32.xlu1 %v1349_v63, %s2169_s3 }
0x152f   :  { %v1352_v35 = vpop.permute.xlu1 %1351 }
0x1530   :  { %v1354_v0 = vadd.f32 %v1352_v35, %v2306_v46  ;;  %v1356_v46 = vsub.f32 1.0, %v2059_v61 }
0x1532   :  { %2060 = vtanh.f32 %v1354_v0 }
0x153c   :  { %v2061_v13 = vpop.eup %2060 }
0x153d   :  { %1358 = vrot.lane.b32.xlu0 %v2061_v13, %s2170_s18 }
0x15af   :  { %v1359_v14 = vpop.permute.xlu0 %1358 }
0x15b0   :  { %v1361_v16 = vmul.f32 %v1359_v14, %v1356_v46 }
0x15b2   :  { %v1363_v42 = vadd.f32 %v1362_v15, %v1361_v16 }
0x15b4   :  { %1373 = vrot.lane.b32.xlu1 %v1363_v42, %s2170_s18 }
0x1626   :  { %v1374_v17 = vpop.permute.xlu1 %1373 }
0x1627   :  { %1564 = vmatmul.mubr.msk.f32.vlgmr.msra.gmra.mrb[30].mxu0 %vm543_vm2, %v1374_v17 }
0x16fa   :  { %v1443_v20 = vpop.f32.mrb[30].mxu0 }
0x16fb   :  { %v1445_v21 = vpop.f32.mrb[31].mxu0  ;;  %v1448_v43 = vmax.f32 %v1443_v20, 0.0 }
0x16fc   :  { %v1449_v22 = vmax.f32 %v1445_v21, 0.0 }
0x16fe   :  { %1526 = vmatprep.mubr.f32.mxu1 %v1449_v22 }
0x16ff   :  { %1527 = vmatmul.mubr.f32.vlgmr.msra.gmra.mrb[26].mxu1 %v1448_v43 }
0x17d2   :  { %v1528_v23 = vpop.f32.mrb[26].mxu1 }
0x17d3   :  { %1533 = vst.msk [vmem:[%s2403_s5] sm:$0xff] %vm1532_vm3, %v1528_v23  ;;  %v1530_v24 = vpop.f32.mrb[27].mxu1 }
0x17d4   :  { %1538 = vsyncpa [#allocation4], 1 }
0x17d5   :  { %1539 = vsyncpa [#allocation6], 1 }
0x17d6   :  { %1540 = vsyncpa [#allocation9], 1 }

</bundles_post_ra>
